<compile_context>
chip_gen: v5e
topology: v5e:2x2
jax: 0.10.0
libtpu: 0.0.40
codegen_flags: <defaults>
</compile_context>

<pallas_src>
import functools

import jax
import jax.numpy as jnp
from jax import lax
from jax.experimental import pallas as pl
from jax.experimental.pallas import tpu as pltpu


def resblock_kernel(w_ref, b_ref, x_ref, o_ref, *, H, W):
    # w_ref: SMEM (C*C*9,) f32   flat conv weights, index = (co*C + ci)*9 + (dy*3 + dx)
    # b_ref: SMEM (C,)     f32   conv bias
    # x_ref: VMEM (1, C, H*W)    one batch element, spatial flattened on the lane axis
    # o_ref: VMEM (1, C, H*W)
    C, P = x_ref.shape[1], x_ref.shape[2]
    x = x_ref[0]                                          # (C, P) f32, lane-dense

    pos = lax.broadcasted_iota(jnp.int32, (C, P), 1)      # flattened spatial index p
    col = pos % W                                         # column (w) index

    # Build the 9 shifted + zero-masked views of the input once (shared by all
    # output channels).  pltpu.roll rides the XLU slot; the masks zero out the
    # wrap-around values, implementing the "same" zero padding in-kernel.
    shifted_rows = []                                     # [tap][ci] -> (1, P)
    for sy in (-1, 0, 1):
        for sx in (-1, 0, 1):
            d = sy * W + sx                               # read offset in flat index
            xs = x if d == 0 else pltpu.roll(x, (-d) % P, axis=1)
            conds = []
            if sy == -1:
                conds.append(pos >= W)                    # h == 0 invalid
            if sy == 1:
                conds.append(pos < (H - 1) * W)           # h == H-1 invalid
            if sx == -1:
                conds.append(col >= 1)                    # w == 0 invalid
            if sx == 1:
                conds.append(col <= W - 2)                # w == W-1 invalid
            if conds:
                valid = conds[0]
                for cnd in conds[1:]:
                    valid = jnp.logical_and(valid, cnd)
                xs = jnp.where(valid, xs, 0.0)
            shifted_rows.append([xs[ci:ci + 1, :] for ci in range(C)])

    # Unrolled VPU FMAs over lane-dense spatial vregs:
    #   acc[co] += w[co, ci, dy, dx] * x_shift[ci]
    rows = []
    for co in range(C):
        acc = jnp.zeros((1, P), jnp.float32)
        for tap in range(9):
            base = co * C * 9 + tap
            srow = shifted_rows[tap]
            for ci in range(C):
                acc = acc + w_ref[base + ci * 9] * srow[ci]
        y = jnp.maximum(acc + b_ref[co], 0.0)             # bias + ReLU, once
        rows.append(x[co:co + 1, :] + y)                  # residual add
    o_ref[0] = jnp.concatenate(rows, axis=0).astype(o_ref.dtype)


def resblock_forward(x_nchw, w_oihw, b):
    """x_nchw: (N, C, H, W) float32. Returns (N, C, H, W)."""
    N, C, H, W = x_nchw.shape
    P = H * W

    # Free layout plumbing (no HBM transposes, no padded duplicate of x).
    x_flat = x_nchw.reshape(N, C, P)                      # bitcast reshape
    w_flat = w_oihw.reshape(C * C * 9)                    # (co*C + ci)*9 + dy*3 + dx
    b_flat = b.reshape(C)

    out = pl.pallas_call(
        functools.partial(resblock_kernel, H=H, W=W),
        out_shape=jax.ShapeDtypeStruct((N, C, P), x_nchw.dtype),
        grid_spec=pltpu.PrefetchScalarGridSpec(
            num_scalar_prefetch=0,
            grid=(N,),
            in_specs=[
                pl.BlockSpec(memory_space=pltpu.MemorySpace.SMEM),   # weights
                pl.BlockSpec(memory_space=pltpu.MemorySpace.SMEM),   # bias
                pl.BlockSpec((1, C, P), lambda n: (n, 0, 0)),        # input
            ],
            out_specs=pl.BlockSpec((1, C, P), lambda n: (n, 0, 0)),
        ),
        compiler_params=pltpu.CompilerParams(
            dimension_semantics=("parallel",)),
    )(w_flat, b_flat, x_flat)

    return out.reshape(N, C, H, W)


def _reference(x_nchw, w_oihw, b):
    """Pure-JAX reference: x + relu(conv2d_same(x))."""
    conv = lax.conv_general_dilated(
        x_nchw, w_oihw, window_strides=(1, 1), padding="SAME",
        dimension_numbers=("NCHW", "OIHW", "NCHW"))
    conv = conv + b.reshape(1, -1, 1, 1)
    return x_nchw + jnp.maximum(conv, 0.0)


if __name__ == "__main__":
    key = jax.random.PRNGKey(0)
    kx, kw, kb = jax.random.split(key, 3)

    N, C, H, W = 2, 4, 16, 16
    x = jax.random.normal(kx, (N, C, H, W), dtype=jnp.float32)

    # Deterministic synthetic parameters for auto_block = Conv2d(C, C, 3, pad=1)+ReLU.
    fan_in = C * 3 * 3
    bound = 1.0 / (fan_in ** 0.5)
    w = jax.random.uniform(kw, (C, C, 3, 3), jnp.float32, -bound, bound)
    b = jax.random.uniform(kb, (C,), jnp.float32, -bound, bound)

    out = jax.block_until_ready(resblock_forward(x, w, b))
    ref = jax.block_until_ready(_reference(x, w, b))

    assert out.shape == (N, C, H, W)
    assert jnp.allclose(out, ref, atol=1e-4, rtol=1e-4), "mismatch vs reference"
    print("KERNEL_OK")
</pallas_src>

<mosaic_0001>
module attributes {stable_mosaic.version = 11 : i64} {
  func.func @resblock_kernel(%arg0: i32, %arg1: memref<144xf32, #tpu.memory_space<smem>>, %arg2: memref<4xf32, #tpu.memory_space<smem>>, %arg3: memref<1x4x256xf32, #tpu.memory_space<vmem>>, %arg4: memref<1x4x256xf32, #tpu.memory_space<vmem>>) attributes {dimension_semantics = [#tpu.dimension_semantics<parallel>], iteration_bounds = array<i64: 2>, scalar_prefetch = 0 : i64, scratch_operands = 0 : i64, tpu.core_type = #tpu.core_type<tc>, window_params = [{transform_indices = @transform_0, window_bounds = array<i64: 144>}, {transform_indices = @transform_1, window_bounds = array<i64: 4>}, {transform_indices = @transform_2, window_bounds = array<i64: 1, 4, 256>}, {transform_indices = @transform_3, window_bounds = array<i64: 1, 4, 256>}]} {
    %c0 = arith.constant 0 : index
    %c0_0 = arith.constant 0 : index
    %c0_1 = arith.constant 0 : index
    %0 = vector.load %arg3[%c0, %c0_0, %c0_1] : memref<1x4x256xf32, #tpu.memory_space<vmem>>, vector<1x4x256xf32>
    %1 = vector.shape_cast %0 : vector<1x4x256xf32> to vector<4x256xf32>
    %2 = tpu.iota {dimensions = array<i32: 1>} : vector<4x256xi32>
    %c16_i32 = arith.constant 16 : i32
    %c0_i32 = arith.constant 0 : i32
    %3 = arith.cmpi eq, %c16_i32, %c0_i32 : i32
    %c1_i32 = arith.constant 1 : i32
    %4 = arith.select %3, %c1_i32, %c16_i32 : i32
    %5 = vector.broadcast %4 : i32 to vector<4x256xi32>
    %6 = arith.remsi %2, %5 : vector<4x256xi32>
    %c0_i32_2 = arith.constant 0 : i32
    %7 = vector.broadcast %c0_i32_2 : i32 to vector<4x256xi32>
    %8 = arith.cmpi ne, %6, %7 : vector<4x256xi32>
    %c0_i32_3 = arith.constant 0 : i32
    %9 = vector.broadcast %c0_i32_3 : i32 to vector<4x256xi32>
    %10 = arith.cmpi slt, %6, %9 : vector<4x256xi32>
    %c0_i32_4 = arith.constant 0 : i32
    %11 = arith.cmpi slt, %4, %c0_i32_4 : i32
    %12 = vector.broadcast %11 : i1 to vector<4x256xi1>
    %13 = vector.broadcast %12 : vector<4x256xi1> to vector<4x256xi1>
    %14 = arith.xori %10, %13 : vector<4x256xi1>
    %15 = arith.andi %14, %8 : vector<4x256xi1>
    %16 = vector.broadcast %4 : i32 to vector<4x256xi32>
    %17 = arith.addi %6, %16 : vector<4x256xi32>
    %18 = arith.select %15, %17, %6 : vector<4x256xi1>, vector<4x256xi32>
    %c17_i32 = arith.constant 17 : i32
    %19 = tpu.dynamic_rotate %1 by %c17_i32 dim 1 : vector<4x256xf32>, i32 -> vector<4x256xf32>
    %c16_i32_5 = arith.constant 16 : i32
    %20 = vector.broadcast %c16_i32_5 : i32 to vector<4x256xi32>
    %21 = arith.cmpi sge, %2, %20 : vector<4x256xi32>
    %c1_i32_6 = arith.constant 1 : i32
    %22 = vector.broadcast %c1_i32_6 : i32 to vector<4x256xi32>
    %23 = arith.cmpi sge, %18, %22 : vector<4x256xi32>
    %24 = arith.andi %21, %23 : vector<4x256xi1>
    %cst = arith.constant 0.000000e+00 : f32
    %25 = vector.broadcast %cst : f32 to vector<4x256xf32>
    %26 = arith.select %24, %19, %25 : vector<4x256xi1>, vector<4x256xf32>
    %27 = vector.extract_strided_slice %26 {offsets = [0, 0], sizes = [1, 256], strides = [1, 1]} : vector<4x256xf32> to vector<1x256xf32>
    %28 = vector.extract_strided_slice %26 {offsets = [1, 0], sizes = [1, 256], strides = [1, 1]} : vector<4x256xf32> to vector<1x256xf32>
    %29 = vector.extract_strided_slice %26 {offsets = [2, 0], sizes = [1, 256], strides = [1, 1]} : vector<4x256xf32> to vector<1x256xf32>
    %30 = vector.extract_strided_slice %26 {offsets = [3, 0], sizes = [1, 256], strides = [1, 1]} : vector<4x256xf32> to vector<1x256xf32>
    %c16_i32_7 = arith.constant 16 : i32
    %31 = tpu.dynamic_rotate %1 by %c16_i32_7 dim 1 : vector<4x256xf32>, i32 -> vector<4x256xf32>
    %c16_i32_8 = arith.constant 16 : i32
    %32 = vector.broadcast %c16_i32_8 : i32 to vector<4x256xi32>
    %33 = arith.cmpi sge, %2, %32 : vector<4x256xi32>
    %cst_9 = arith.constant 0.000000e+00 : f32
    %34 = vector.broadcast %cst_9 : f32 to vector<4x256xf32>
    %35 = arith.select %33, %31, %34 : vector<4x256xi1>, vector<4x256xf32>
    %36 = vector.extract_strided_slice %35 {offsets = [0, 0], sizes = [1, 256], strides = [1, 1]} : vector<4x256xf32> to vector<1x256xf32>
    %37 = vector.extract_strided_slice %35 {offsets = [1, 0], sizes = [1, 256], strides = [1, 1]} : vector<4x256xf32> to vector<1x256xf32>
    %38 = vector.extract_strided_slice %35 {offsets = [2, 0], sizes = [1, 256], strides = [1, 1]} : vector<4x256xf32> to vector<1x256xf32>
    %39 = vector.extract_strided_slice %35 {offsets = [3, 0], sizes = [1, 256], strides = [1, 1]} : vector<4x256xf32> to vector<1x256xf32>
    %c15_i32 = arith.constant 15 : i32
    %40 = tpu.dynamic_rotate %1 by %c15_i32 dim 1 : vector<4x256xf32>, i32 -> vector<4x256xf32>
    %c16_i32_10 = arith.constant 16 : i32
    %41 = vector.broadcast %c16_i32_10 : i32 to vector<4x256xi32>
    %42 = arith.cmpi sge, %2, %41 : vector<4x256xi32>
    %c14_i32 = arith.constant 14 : i32
    %43 = vector.broadcast %c14_i32 : i32 to vector<4x256xi32>
    %44 = arith.cmpi sle, %18, %43 : vector<4x256xi32>
    %45 = arith.andi %42, %44 : vector<4x256xi1>
    %cst_11 = arith.constant 0.000000e+00 : f32
    %46 = vector.broadcast %cst_11 : f32 to vector<4x256xf32>
    %47 = arith.select %45, %40, %46 : vector<4x256xi1>, vector<4x256xf32>
    %48 = vector.extract_strided_slice %47 {offsets = [0, 0], sizes = [1, 256], strides = [1, 1]} : vector<4x256xf32> to vector<1x256xf32>
    %49 = vector.extract_strided_slice %47 {offsets = [1, 0], sizes = [1, 256], strides = [1, 1]} : vector<4x256xf32> to vector<1x256xf32>
    %50 = vector.extract_strided_slice %47 {offsets = [2, 0], sizes = [1, 256], strides = [1, 1]} : vector<4x256xf32> to vector<1x256xf32>
    %51 = vector.extract_strided_slice %47 {offsets = [3, 0], sizes = [1, 256], strides = [1, 1]} : vector<4x256xf32> to vector<1x256xf32>
    %c1_i32_12 = arith.constant 1 : i32
    %52 = tpu.dynamic_rotate %1 by %c1_i32_12 dim 1 : vector<4x256xf32>, i32 -> vector<4x256xf32>
    %c1_i32_13 = arith.constant 1 : i32
    %53 = vector.broadcast %c1_i32_13 : i32 to vector<4x256xi32>
    %54 = arith.cmpi sge, %18, %53 : vector<4x256xi32>
    %cst_14 = arith.constant 0.000000e+00 : f32
    %55 = vector.broadcast %cst_14 : f32 to vector<4x256xf32>
    %56 = arith.select %54, %52, %55 : vector<4x256xi1>, vector<4x256xf32>
    %57 = vector.extract_strided_slice %56 {offsets = [0, 0], sizes = [1, 256], strides = [1, 1]} : vector<4x256xf32> to vector<1x256xf32>
    %58 = vector.extract_strided_slice %56 {offsets = [1, 0], sizes = [1, 256], strides = [1, 1]} : vector<4x256xf32> to vector<1x256xf32>
    %59 = vector.extract_strided_slice %56 {offsets = [2, 0], sizes = [1, 256], strides = [1, 1]} : vector<4x256xf32> to vector<1x256xf32>
    %60 = vector.extract_strided_slice %56 {offsets = [3, 0], sizes = [1, 256], strides = [1, 1]} : vector<4x256xf32> to vector<1x256xf32>
    %61 = vector.extract_strided_slice %1 {offsets = [0, 0], sizes = [1, 256], strides = [1, 1]} : vector<4x256xf32> to vector<1x256xf32>
    %62 = vector.extract_strided_slice %1 {offsets = [1, 0], sizes = [1, 256], strides = [1, 1]} : vector<4x256xf32> to vector<1x256xf32>
    %63 = vector.extract_strided_slice %1 {offsets = [2, 0], sizes = [1, 256], strides = [1, 1]} : vector<4x256xf32> to vector<1x256xf32>
    %64 = vector.extract_strided_slice %1 {offsets = [3, 0], sizes = [1, 256], strides = [1, 1]} : vector<4x256xf32> to vector<1x256xf32>
    %c255_i32 = arith.constant 255 : i32
    %65 = tpu.dynamic_rotate %1 by %c255_i32 dim 1 : vector<4x256xf32>, i32 -> vector<4x256xf32>
    %c14_i32_15 = arith.constant 14 : i32
    %66 = vector.broadcast %c14_i32_15 : i32 to vector<4x256xi32>
    %67 = arith.cmpi sle, %18, %66 : vector<4x256xi32>
    %cst_16 = arith.constant 0.000000e+00 : f32
    %68 = vector.broadcast %cst_16 : f32 to vector<4x256xf32>
    %69 = arith.select %67, %65, %68 : vector<4x256xi1>, vector<4x256xf32>
    %70 = vector.extract_strided_slice %69 {offsets = [0, 0], sizes = [1, 256], strides = [1, 1]} : vector<4x256xf32> to vector<1x256xf32>
    %71 = vector.extract_strided_slice %69 {offsets = [1, 0], sizes = [1, 256], strides = [1, 1]} : vector<4x256xf32> to vector<1x256xf32>
    %72 = vector.extract_strided_slice %69 {offsets = [2, 0], sizes = [1, 256], strides = [1, 1]} : vector<4x256xf32> to vector<1x256xf32>
    %73 = vector.extract_strided_slice %69 {offsets = [3, 0], sizes = [1, 256], strides = [1, 1]} : vector<4x256xf32> to vector<1x256xf32>
    %c241_i32 = arith.constant 241 : i32
    %74 = tpu.dynamic_rotate %1 by %c241_i32 dim 1 : vector<4x256xf32>, i32 -> vector<4x256xf32>
    %c240_i32 = arith.constant 240 : i32
    %75 = vector.broadcast %c240_i32 : i32 to vector<4x256xi32>
    %76 = arith.cmpi slt, %2, %75 : vector<4x256xi32>
    %c1_i32_17 = arith.constant 1 : i32
    %77 = vector.broadcast %c1_i32_17 : i32 to vector<4x256xi32>
    %78 = arith.cmpi sge, %18, %77 : vector<4x256xi32>
    %79 = arith.andi %76, %78 : vector<4x256xi1>
    %cst_18 = arith.constant 0.000000e+00 : f32
    %80 = vector.broadcast %cst_18 : f32 to vector<4x256xf32>
    %81 = arith.select %79, %74, %80 : vector<4x256xi1>, vector<4x256xf32>
    %82 = vector.extract_strided_slice %81 {offsets = [0, 0], sizes = [1, 256], strides = [1, 1]} : vector<4x256xf32> to vector<1x256xf32>
    %83 = vector.extract_strided_slice %81 {offsets = [1, 0], sizes = [1, 256], strides = [1, 1]} : vector<4x256xf32> to vector<1x256xf32>
    %84 = vector.extract_strided_slice %81 {offsets = [2, 0], sizes = [1, 256], strides = [1, 1]} : vector<4x256xf32> to vector<1x256xf32>
    %85 = vector.extract_strided_slice %81 {offsets = [3, 0], sizes = [1, 256], strides = [1, 1]} : vector<4x256xf32> to vector<1x256xf32>
    %c240_i32_19 = arith.constant 240 : i32
    %86 = tpu.dynamic_rotate %1 by %c240_i32_19 dim 1 : vector<4x256xf32>, i32 -> vector<4x256xf32>
    %c240_i32_20 = arith.constant 240 : i32
    %87 = vector.broadcast %c240_i32_20 : i32 to vector<4x256xi32>
    %88 = arith.cmpi slt, %2, %87 : vector<4x256xi32>
    %cst_21 = arith.constant 0.000000e+00 : f32
    %89 = vector.broadcast %cst_21 : f32 to vector<4x256xf32>
    %90 = arith.select %88, %86, %89 : vector<4x256xi1>, vector<4x256xf32>
    %91 = vector.extract_strided_slice %90 {offsets = [0, 0], sizes = [1, 256], strides = [1, 1]} : vector<4x256xf32> to vector<1x256xf32>
    %92 = vector.extract_strided_slice %90 {offsets = [1, 0], sizes = [1, 256], strides = [1, 1]} : vector<4x256xf32> to vector<1x256xf32>
    %93 = vector.extract_strided_slice %90 {offsets = [2, 0], sizes = [1, 256], strides = [1, 1]} : vector<4x256xf32> to vector<1x256xf32>
    %94 = vector.extract_strided_slice %90 {offsets = [3, 0], sizes = [1, 256], strides = [1, 1]} : vector<4x256xf32> to vector<1x256xf32>
    %c239_i32 = arith.constant 239 : i32
    %95 = tpu.dynamic_rotate %1 by %c239_i32 dim 1 : vector<4x256xf32>, i32 -> vector<4x256xf32>
    %c240_i32_22 = arith.constant 240 : i32
    %96 = vector.broadcast %c240_i32_22 : i32 to vector<4x256xi32>
    %97 = arith.cmpi slt, %2, %96 : vector<4x256xi32>
    %c14_i32_23 = arith.constant 14 : i32
    %98 = vector.broadcast %c14_i32_23 : i32 to vector<4x256xi32>
    %99 = arith.cmpi sle, %18, %98 : vector<4x256xi32>
    %100 = arith.andi %97, %99 : vector<4x256xi1>
    %cst_24 = arith.constant 0.000000e+00 : f32
    %101 = vector.broadcast %cst_24 : f32 to vector<4x256xf32>
    %102 = arith.select %100, %95, %101 : vector<4x256xi1>, vector<4x256xf32>
    %103 = vector.extract_strided_slice %102 {offsets = [0, 0], sizes = [1, 256], strides = [1, 1]} : vector<4x256xf32> to vector<1x256xf32>
    %104 = vector.extract_strided_slice %102 {offsets = [1, 0], sizes = [1, 256], strides = [1, 1]} : vector<4x256xf32> to vector<1x256xf32>
    %105 = vector.extract_strided_slice %102 {offsets = [2, 0], sizes = [1, 256], strides = [1, 1]} : vector<4x256xf32> to vector<1x256xf32>
    %106 = vector.extract_strided_slice %102 {offsets = [3, 0], sizes = [1, 256], strides = [1, 1]} : vector<4x256xf32> to vector<1x256xf32>
    %cst_25 = arith.constant 0.000000e+00 : f32
    %107 = vector.broadcast %cst_25 : f32 to vector<1x256xf32>
    %c0_26 = arith.constant 0 : index
    %108 = memref.load %arg1[%c0_26] : memref<144xf32, #tpu.memory_space<smem>>
    %109 = vector.broadcast %108 : f32 to vector<1x256xf32>
    %110 = arith.mulf %109, %27 : vector<1x256xf32>
    %111 = arith.addf %107, %110 : vector<1x256xf32>
    %c9 = arith.constant 9 : index
    %112 = memref.load %arg1[%c9] : memref<144xf32, #tpu.memory_space<smem>>
    %113 = vector.broadcast %112 : f32 to vector<1x256xf32>
    %114 = arith.mulf %113, %28 : vector<1x256xf32>
    %115 = arith.addf %111, %114 : vector<1x256xf32>
    %c18 = arith.constant 18 : index
    %116 = memref.load %arg1[%c18] : memref<144xf32, #tpu.memory_space<smem>>
    %117 = vector.broadcast %116 : f32 to vector<1x256xf32>
    %118 = arith.mulf %117, %29 : vector<1x256xf32>
    %119 = arith.addf %115, %118 : vector<1x256xf32>
    %c27 = arith.constant 27 : index
    %120 = memref.load %arg1[%c27] : memref<144xf32, #tpu.memory_space<smem>>
    %121 = vector.broadcast %120 : f32 to vector<1x256xf32>
    %122 = arith.mulf %121, %30 : vector<1x256xf32>
    %123 = arith.addf %119, %122 : vector<1x256xf32>
    %c1 = arith.constant 1 : index
    %124 = memref.load %arg1[%c1] : memref<144xf32, #tpu.memory_space<smem>>
    %125 = vector.broadcast %124 : f32 to vector<1x256xf32>
    %126 = arith.mulf %125, %36 : vector<1x256xf32>
    %127 = arith.addf %123, %126 : vector<1x256xf32>
    %c10 = arith.constant 10 : index
    %128 = memref.load %arg1[%c10] : memref<144xf32, #tpu.memory_space<smem>>
    %129 = vector.broadcast %128 : f32 to vector<1x256xf32>
    %130 = arith.mulf %129, %37 : vector<1x256xf32>
    %131 = arith.addf %127, %130 : vector<1x256xf32>
    %c19 = arith.constant 19 : index
    %132 = memref.load %arg1[%c19] : memref<144xf32, #tpu.memory_space<smem>>
    %133 = vector.broadcast %132 : f32 to vector<1x256xf32>
    %134 = arith.mulf %133, %38 : vector<1x256xf32>
    %135 = arith.addf %131, %134 : vector<1x256xf32>
    %c28 = arith.constant 28 : index
    %136 = memref.load %arg1[%c28] : memref<144xf32, #tpu.memory_space<smem>>
    %137 = vector.broadcast %136 : f32 to vector<1x256xf32>
    %138 = arith.mulf %137, %39 : vector<1x256xf32>
    %139 = arith.addf %135, %138 : vector<1x256xf32>
    %c2 = arith.constant 2 : index
    %140 = memref.load %arg1[%c2] : memref<144xf32, #tpu.memory_space<smem>>
    %141 = vector.broadcast %140 : f32 to vector<1x256xf32>
    %142 = arith.mulf %141, %48 : vector<1x256xf32>
    %143 = arith.addf %139, %142 : vector<1x256xf32>
    %c11 = arith.constant 11 : index
    %144 = memref.load %arg1[%c11] : memref<144xf32, #tpu.memory_space<smem>>
    %145 = vector.broadcast %144 : f32 to vector<1x256xf32>
    %146 = arith.mulf %145, %49 : vector<1x256xf32>
    %147 = arith.addf %143, %146 : vector<1x256xf32>
    %c20 = arith.constant 20 : index
    %148 = memref.load %arg1[%c20] : memref<144xf32, #tpu.memory_space<smem>>
    %149 = vector.broadcast %148 : f32 to vector<1x256xf32>
    %150 = arith.mulf %149, %50 : vector<1x256xf32>
    %151 = arith.addf %147, %150 : vector<1x256xf32>
    %c29 = arith.constant 29 : index
    %152 = memref.load %arg1[%c29] : memref<144xf32, #tpu.memory_space<smem>>
    %153 = vector.broadcast %152 : f32 to vector<1x256xf32>
    %154 = arith.mulf %153, %51 : vector<1x256xf32>
    %155 = arith.addf %151, %154 : vector<1x256xf32>
    %c3 = arith.constant 3 : index
    %156 = memref.load %arg1[%c3] : memref<144xf32, #tpu.memory_space<smem>>
    %157 = vector.broadcast %156 : f32 to vector<1x256xf32>
    %158 = arith.mulf %157, %57 : vector<1x256xf32>
    %159 = arith.addf %155, %158 : vector<1x256xf32>
    %c12 = arith.constant 12 : index
    %160 = memref.load %arg1[%c12] : memref<144xf32, #tpu.memory_space<smem>>
    %161 = vector.broadcast %160 : f32 to vector<1x256xf32>
    %162 = arith.mulf %161, %58 : vector<1x256xf32>
    %163 = arith.addf %159, %162 : vector<1x256xf32>
    %c21 = arith.constant 21 : index
    %164 = memref.load %arg1[%c21] : memref<144xf32, #tpu.memory_space<smem>>
    %165 = vector.broadcast %164 : f32 to vector<1x256xf32>
    %166 = arith.mulf %165, %59 : vector<1x256xf32>
    %167 = arith.addf %163, %166 : vector<1x256xf32>
    %c30 = arith.constant 30 : index
    %168 = memref.load %arg1[%c30] : memref<144xf32, #tpu.memory_space<smem>>
    %169 = vector.broadcast %168 : f32 to vector<1x256xf32>
    %170 = arith.mulf %169, %60 : vector<1x256xf32>
    %171 = arith.addf %167, %170 : vector<1x256xf32>
    %c4 = arith.constant 4 : index
    %172 = memref.load %arg1[%c4] : memref<144xf32, #tpu.memory_space<smem>>
    %173 = vector.broadcast %172 : f32 to vector<1x256xf32>
    %174 = arith.mulf %173, %61 : vector<1x256xf32>
    %175 = arith.addf %171, %174 : vector<1x256xf32>
    %c13 = arith.constant 13 : index
    %176 = memref.load %arg1[%c13] : memref<144xf32, #tpu.memory_space<smem>>
    %177 = vector.broadcast %176 : f32 to vector<1x256xf32>
    %178 = arith.mulf %177, %62 : vector<1x256xf32>
    %179 = arith.addf %175, %178 : vector<1x256xf32>
    %c22 = arith.constant 22 : index
    %180 = memref.load %arg1[%c22] : memref<144xf32, #tpu.memory_space<smem>>
    %181 = vector.broadcast %180 : f32 to vector<1x256xf32>
    %182 = arith.mulf %181, %63 : vector<1x256xf32>
    %183 = arith.addf %179, %182 : vector<1x256xf32>
    %c31 = arith.constant 31 : index
    %184 = memref.load %arg1[%c31] : memref<144xf32, #tpu.memory_space<smem>>
    %185 = vector.broadcast %184 : f32 to vector<1x256xf32>
    %186 = arith.mulf %185, %64 : vector<1x256xf32>
    %187 = arith.addf %183, %186 : vector<1x256xf32>
    %c5 = arith.constant 5 : index
    %188 = memref.load %arg1[%c5] : memref<144xf32, #tpu.memory_space<smem>>
    %189 = vector.broadcast %188 : f32 to vector<1x256xf32>
    %190 = arith.mulf %189, %70 : vector<1x256xf32>
    %191 = arith.addf %187, %190 : vector<1x256xf32>
    %c14 = arith.constant 14 : index
    %192 = memref.load %arg1[%c14] : memref<144xf32, #tpu.memory_space<smem>>
    %193 = vector.broadcast %192 : f32 to vector<1x256xf32>
    %194 = arith.mulf %193, %71 : vector<1x256xf32>
    %195 = arith.addf %191, %194 : vector<1x256xf32>
    %c23 = arith.constant 23 : index
    %196 = memref.load %arg1[%c23] : memref<144xf32, #tpu.memory_space<smem>>
    %197 = vector.broadcast %196 : f32 to vector<1x256xf32>
    %198 = arith.mulf %197, %72 : vector<1x256xf32>
    %199 = arith.addf %195, %198 : vector<1x256xf32>
    %c32 = arith.constant 32 : index
    %200 = memref.load %arg1[%c32] : memref<144xf32, #tpu.memory_space<smem>>
    %201 = vector.broadcast %200 : f32 to vector<1x256xf32>
    %202 = arith.mulf %201, %73 : vector<1x256xf32>
    %203 = arith.addf %199, %202 : vector<1x256xf32>
    %c6 = arith.constant 6 : index
    %204 = memref.load %arg1[%c6] : memref<144xf32, #tpu.memory_space<smem>>
    %205 = vector.broadcast %204 : f32 to vector<1x256xf32>
    %206 = arith.mulf %205, %82 : vector<1x256xf32>
    %207 = arith.addf %203, %206 : vector<1x256xf32>
    %c15 = arith.constant 15 : index
    %208 = memref.load %arg1[%c15] : memref<144xf32, #tpu.memory_space<smem>>
    %209 = vector.broadcast %208 : f32 to vector<1x256xf32>
    %210 = arith.mulf %209, %83 : vector<1x256xf32>
    %211 = arith.addf %207, %210 : vector<1x256xf32>
    %c24 = arith.constant 24 : index
    %212 = memref.load %arg1[%c24] : memref<144xf32, #tpu.memory_space<smem>>
    %213 = vector.broadcast %212 : f32 to vector<1x256xf32>
    %214 = arith.mulf %213, %84 : vector<1x256xf32>
    %215 = arith.addf %211, %214 : vector<1x256xf32>
    %c33 = arith.constant 33 : index
    %216 = memref.load %arg1[%c33] : memref<144xf32, #tpu.memory_space<smem>>
    %217 = vector.broadcast %216 : f32 to vector<1x256xf32>
    %218 = arith.mulf %217, %85 : vector<1x256xf32>
    %219 = arith.addf %215, %218 : vector<1x256xf32>
    %c7 = arith.constant 7 : index
    %220 = memref.load %arg1[%c7] : memref<144xf32, #tpu.memory_space<smem>>
    %221 = vector.broadcast %220 : f32 to vector<1x256xf32>
    %222 = arith.mulf %221, %91 : vector<1x256xf32>
    %223 = arith.addf %219, %222 : vector<1x256xf32>
    %c16 = arith.constant 16 : index
    %224 = memref.load %arg1[%c16] : memref<144xf32, #tpu.memory_space<smem>>
    %225 = vector.broadcast %224 : f32 to vector<1x256xf32>
    %226 = arith.mulf %225, %92 : vector<1x256xf32>
    %227 = arith.addf %223, %226 : vector<1x256xf32>
    %c25 = arith.constant 25 : index
    %228 = memref.load %arg1[%c25] : memref<144xf32, #tpu.memory_space<smem>>
    %229 = vector.broadcast %228 : f32 to vector<1x256xf32>
    %230 = arith.mulf %229, %93 : vector<1x256xf32>
    %231 = arith.addf %227, %230 : vector<1x256xf32>
    %c34 = arith.constant 34 : index
    %232 = memref.load %arg1[%c34] : memref<144xf32, #tpu.memory_space<smem>>
    %233 = vector.broadcast %232 : f32 to vector<1x256xf32>
    %234 = arith.mulf %233, %94 : vector<1x256xf32>
    %235 = arith.addf %231, %234 : vector<1x256xf32>
    %c8 = arith.constant 8 : index
    %236 = memref.load %arg1[%c8] : memref<144xf32, #tpu.memory_space<smem>>
    %237 = vector.broadcast %236 : f32 to vector<1x256xf32>
    %238 = arith.mulf %237, %103 : vector<1x256xf32>
    %239 = arith.addf %235, %238 : vector<1x256xf32>
    %c17 = arith.constant 17 : index
    %240 = memref.load %arg1[%c17] : memref<144xf32, #tpu.memory_space<smem>>
    %241 = vector.broadcast %240 : f32 to vector<1x256xf32>
    %242 = arith.mulf %241, %104 : vector<1x256xf32>
    %243 = arith.addf %239, %242 : vector<1x256xf32>
    %c26 = arith.constant 26 : index
    %244 = memref.load %arg1[%c26] : memref<144xf32, #tpu.memory_space<smem>>
    %245 = vector.broadcast %244 : f32 to vector<1x256xf32>
    %246 = arith.mulf %245, %105 : vector<1x256xf32>
    %247 = arith.addf %243, %246 : vector<1x256xf32>
    %c35 = arith.constant 35 : index
    %248 = memref.load %arg1[%c35] : memref<144xf32, #tpu.memory_space<smem>>
    %249 = vector.broadcast %248 : f32 to vector<1x256xf32>
    %250 = arith.mulf %249, %106 : vector<1x256xf32>
    %251 = arith.addf %247, %250 : vector<1x256xf32>
    %c0_27 = arith.constant 0 : index
    %252 = memref.load %arg2[%c0_27] : memref<4xf32, #tpu.memory_space<smem>>
    %253 = vector.broadcast %252 : f32 to vector<1x256xf32>
    %254 = arith.addf %251, %253 : vector<1x256xf32>
    %cst_28 = arith.constant 0.000000e+00 : f32
    %255 = vector.broadcast %cst_28 : f32 to vector<1x256xf32>
    %256 = arith.maximumf %254, %255 : vector<1x256xf32>
    %257 = vector.extract_strided_slice %1 {offsets = [0, 0], sizes = [1, 256], strides = [1, 1]} : vector<4x256xf32> to vector<1x256xf32>
    %258 = arith.addf %257, %256 : vector<1x256xf32>
    %cst_29 = arith.constant 0.000000e+00 : f32
    %259 = vector.broadcast %cst_29 : f32 to vector<1x256xf32>
    %c36 = arith.constant 36 : index
    %260 = memref.load %arg1[%c36] : memref<144xf32, #tpu.memory_space<smem>>
    %261 = vector.broadcast %260 : f32 to vector<1x256xf32>
    %262 = arith.mulf %261, %27 : vector<1x256xf32>
    %263 = arith.addf %259, %262 : vector<1x256xf32>
    %c45 = arith.constant 45 : index
    %264 = memref.load %arg1[%c45] : memref<144xf32, #tpu.memory_space<smem>>
    %265 = vector.broadcast %264 : f32 to vector<1x256xf32>
    %266 = arith.mulf %265, %28 : vector<1x256xf32>
    %267 = arith.addf %263, %266 : vector<1x256xf32>
    %c54 = arith.constant 54 : index
    %268 = memref.load %arg1[%c54] : memref<144xf32, #tpu.memory_space<smem>>
    %269 = vector.broadcast %268 : f32 to vector<1x256xf32>
    %270 = arith.mulf %269, %29 : vector<1x256xf32>
    %271 = arith.addf %267, %270 : vector<1x256xf32>
    %c63 = arith.constant 63 : index
    %272 = memref.load %arg1[%c63] : memref<144xf32, #tpu.memory_space<smem>>
    %273 = vector.broadcast %272 : f32 to vector<1x256xf32>
    %274 = arith.mulf %273, %30 : vector<1x256xf32>
    %275 = arith.addf %271, %274 : vector<1x256xf32>
    %c37 = arith.constant 37 : index
    %276 = memref.load %arg1[%c37] : memref<144xf32, #tpu.memory_space<smem>>
    %277 = vector.broadcast %276 : f32 to vector<1x256xf32>
    %278 = arith.mulf %277, %36 : vector<1x256xf32>
    %279 = arith.addf %275, %278 : vector<1x256xf32>
    %c46 = arith.constant 46 : index
    %280 = memref.load %arg1[%c46] : memref<144xf32, #tpu.memory_space<smem>>
    %281 = vector.broadcast %280 : f32 to vector<1x256xf32>
    %282 = arith.mulf %281, %37 : vector<1x256xf32>
    %283 = arith.addf %279, %282 : vector<1x256xf32>
    %c55 = arith.constant 55 : index
    %284 = memref.load %arg1[%c55] : memref<144xf32, #tpu.memory_space<smem>>
    %285 = vector.broadcast %284 : f32 to vector<1x256xf32>
    %286 = arith.mulf %285, %38 : vector<1x256xf32>
    %287 = arith.addf %283, %286 : vector<1x256xf32>
    %c64 = arith.constant 64 : index
    %288 = memref.load %arg1[%c64] : memref<144xf32, #tpu.memory_space<smem>>
    %289 = vector.broadcast %288 : f32 to vector<1x256xf32>
    %290 = arith.mulf %289, %39 : vector<1x256xf32>
    %291 = arith.addf %287, %290 : vector<1x256xf32>
    %c38 = arith.constant 38 : index
    %292 = memref.load %arg1[%c38] : memref<144xf32, #tpu.memory_space<smem>>
    %293 = vector.broadcast %292 : f32 to vector<1x256xf32>
    %294 = arith.mulf %293, %48 : vector<1x256xf32>
    %295 = arith.addf %291, %294 : vector<1x256xf32>
    %c47 = arith.constant 47 : index
    %296 = memref.load %arg1[%c47] : memref<144xf32, #tpu.memory_space<smem>>
    %297 = vector.broadcast %296 : f32 to vector<1x256xf32>
    %298 = arith.mulf %297, %49 : vector<1x256xf32>
    %299 = arith.addf %295, %298 : vector<1x256xf32>
    %c56 = arith.constant 56 : index
    %300 = memref.load %arg1[%c56] : memref<144xf32, #tpu.memory_space<smem>>
    %301 = vector.broadcast %300 : f32 to vector<1x256xf32>
    %302 = arith.mulf %301, %50 : vector<1x256xf32>
    %303 = arith.addf %299, %302 : vector<1x256xf32>
    %c65 = arith.constant 65 : index
    %304 = memref.load %arg1[%c65] : memref<144xf32, #tpu.memory_space<smem>>
    %305 = vector.broadcast %304 : f32 to vector<1x256xf32>
    %306 = arith.mulf %305, %51 : vector<1x256xf32>
    %307 = arith.addf %303, %306 : vector<1x256xf32>
    %c39 = arith.constant 39 : index
    %308 = memref.load %arg1[%c39] : memref<144xf32, #tpu.memory_space<smem>>
    %309 = vector.broadcast %308 : f32 to vector<1x256xf32>
    %310 = arith.mulf %309, %57 : vector<1x256xf32>
    %311 = arith.addf %307, %310 : vector<1x256xf32>
    %c48 = arith.constant 48 : index
    %312 = memref.load %arg1[%c48] : memref<144xf32, #tpu.memory_space<smem>>
    %313 = vector.broadcast %312 : f32 to vector<1x256xf32>
    %314 = arith.mulf %313, %58 : vector<1x256xf32>
    %315 = arith.addf %311, %314 : vector<1x256xf32>
    %c57 = arith.constant 57 : index
    %316 = memref.load %arg1[%c57] : memref<144xf32, #tpu.memory_space<smem>>
    %317 = vector.broadcast %316 : f32 to vector<1x256xf32>
    %318 = arith.mulf %317, %59 : vector<1x256xf32>
    %319 = arith.addf %315, %318 : vector<1x256xf32>
    %c66 = arith.constant 66 : index
    %320 = memref.load %arg1[%c66] : memref<144xf32, #tpu.memory_space<smem>>
    %321 = vector.broadcast %320 : f32 to vector<1x256xf32>
    %322 = arith.mulf %321, %60 : vector<1x256xf32>
    %323 = arith.addf %319, %322 : vector<1x256xf32>
    %c40 = arith.constant 40 : index
    %324 = memref.load %arg1[%c40] : memref<144xf32, #tpu.memory_space<smem>>
    %325 = vector.broadcast %324 : f32 to vector<1x256xf32>
    %326 = arith.mulf %325, %61 : vector<1x256xf32>
    %327 = arith.addf %323, %326 : vector<1x256xf32>
    %c49 = arith.constant 49 : index
    %328 = memref.load %arg1[%c49] : memref<144xf32, #tpu.memory_space<smem>>
    %329 = vector.broadcast %328 : f32 to vector<1x256xf32>
    %330 = arith.mulf %329, %62 : vector<1x256xf32>
    %331 = arith.addf %327, %330 : vector<1x256xf32>
    %c58 = arith.constant 58 : index
    %332 = memref.load %arg1[%c58] : memref<144xf32, #tpu.memory_space<smem>>
    %333 = vector.broadcast %332 : f32 to vector<1x256xf32>
    %334 = arith.mulf %333, %63 : vector<1x256xf32>
    %335 = arith.addf %331, %334 : vector<1x256xf32>
    %c67 = arith.constant 67 : index
    %336 = memref.load %arg1[%c67] : memref<144xf32, #tpu.memory_space<smem>>
    %337 = vector.broadcast %336 : f32 to vector<1x256xf32>
    %338 = arith.mulf %337, %64 : vector<1x256xf32>
    %339 = arith.addf %335, %338 : vector<1x256xf32>
    %c41 = arith.constant 41 : index
    %340 = memref.load %arg1[%c41] : memref<144xf32, #tpu.memory_space<smem>>
    %341 = vector.broadcast %340 : f32 to vector<1x256xf32>
    %342 = arith.mulf %341, %70 : vector<1x256xf32>
    %343 = arith.addf %339, %342 : vector<1x256xf32>
    %c50 = arith.constant 50 : index
    %344 = memref.load %arg1[%c50] : memref<144xf32, #tpu.memory_space<smem>>
    %345 = vector.broadcast %344 : f32 to vector<1x256xf32>
    %346 = arith.mulf %345, %71 : vector<1x256xf32>
    %347 = arith.addf %343, %346 : vector<1x256xf32>
    %c59 = arith.constant 59 : index
    %348 = memref.load %arg1[%c59] : memref<144xf32, #tpu.memory_space<smem>>
    %349 = vector.broadcast %348 : f32 to vector<1x256xf32>
    %350 = arith.mulf %349, %72 : vector<1x256xf32>
    %351 = arith.addf %347, %350 : vector<1x256xf32>
    %c68 = arith.constant 68 : index
    %352 = memref.load %arg1[%c68] : memref<144xf32, #tpu.memory_space<smem>>
    %353 = vector.broadcast %352 : f32 to vector<1x256xf32>
    %354 = arith.mulf %353, %73 : vector<1x256xf32>
    %355 = arith.addf %351, %354 : vector<1x256xf32>
    %c42 = arith.constant 42 : index
    %356 = memref.load %arg1[%c42] : memref<144xf32, #tpu.memory_space<smem>>
    %357 = vector.broadcast %356 : f32 to vector<1x256xf32>
    %358 = arith.mulf %357, %82 : vector<1x256xf32>
    %359 = arith.addf %355, %358 : vector<1x256xf32>
    %c51 = arith.constant 51 : index
    %360 = memref.load %arg1[%c51] : memref<144xf32, #tpu.memory_space<smem>>
    %361 = vector.broadcast %360 : f32 to vector<1x256xf32>
    %362 = arith.mulf %361, %83 : vector<1x256xf32>
    %363 = arith.addf %359, %362 : vector<1x256xf32>
    %c60 = arith.constant 60 : index
    %364 = memref.load %arg1[%c60] : memref<144xf32, #tpu.memory_space<smem>>
    %365 = vector.broadcast %364 : f32 to vector<1x256xf32>
    %366 = arith.mulf %365, %84 : vector<1x256xf32>
    %367 = arith.addf %363, %366 : vector<1x256xf32>
    %c69 = arith.constant 69 : index
    %368 = memref.load %arg1[%c69] : memref<144xf32, #tpu.memory_space<smem>>
    %369 = vector.broadcast %368 : f32 to vector<1x256xf32>
    %370 = arith.mulf %369, %85 : vector<1x256xf32>
    %371 = arith.addf %367, %370 : vector<1x256xf32>
    %c43 = arith.constant 43 : index
    %372 = memref.load %arg1[%c43] : memref<144xf32, #tpu.memory_space<smem>>
    %373 = vector.broadcast %372 : f32 to vector<1x256xf32>
    %374 = arith.mulf %373, %91 : vector<1x256xf32>
    %375 = arith.addf %371, %374 : vector<1x256xf32>
    %c52 = arith.constant 52 : index
    %376 = memref.load %arg1[%c52] : memref<144xf32, #tpu.memory_space<smem>>
    %377 = vector.broadcast %376 : f32 to vector<1x256xf32>
    %378 = arith.mulf %377, %92 : vector<1x256xf32>
    %379 = arith.addf %375, %378 : vector<1x256xf32>
    %c61 = arith.constant 61 : index
    %380 = memref.load %arg1[%c61] : memref<144xf32, #tpu.memory_space<smem>>
    %381 = vector.broadcast %380 : f32 to vector<1x256xf32>
    %382 = arith.mulf %381, %93 : vector<1x256xf32>
    %383 = arith.addf %379, %382 : vector<1x256xf32>
    %c70 = arith.constant 70 : index
    %384 = memref.load %arg1[%c70] : memref<144xf32, #tpu.memory_space<smem>>
    %385 = vector.broadcast %384 : f32 to vector<1x256xf32>
    %386 = arith.mulf %385, %94 : vector<1x256xf32>
    %387 = arith.addf %383, %386 : vector<1x256xf32>
    %c44 = arith.constant 44 : index
    %388 = memref.load %arg1[%c44] : memref<144xf32, #tpu.memory_space<smem>>
    %389 = vector.broadcast %388 : f32 to vector<1x256xf32>
    %390 = arith.mulf %389, %103 : vector<1x256xf32>
    %391 = arith.addf %387, %390 : vector<1x256xf32>
    %c53 = arith.constant 53 : index
    %392 = memref.load %arg1[%c53] : memref<144xf32, #tpu.memory_space<smem>>
    %393 = vector.broadcast %392 : f32 to vector<1x256xf32>
    %394 = arith.mulf %393, %104 : vector<1x256xf32>
    %395 = arith.addf %391, %394 : vector<1x256xf32>
    %c62 = arith.constant 62 : index
    %396 = memref.load %arg1[%c62] : memref<144xf32, #tpu.memory_space<smem>>
    %397 = vector.broadcast %396 : f32 to vector<1x256xf32>
    %398 = arith.mulf %397, %105 : vector<1x256xf32>
    %399 = arith.addf %395, %398 : vector<1x256xf32>
    %c71 = arith.constant 71 : index
    %400 = memref.load %arg1[%c71] : memref<144xf32, #tpu.memory_space<smem>>
    %401 = vector.broadcast %400 : f32 to vector<1x256xf32>
    %402 = arith.mulf %401, %106 : vector<1x256xf32>
    %403 = arith.addf %399, %402 : vector<1x256xf32>
    %c1_30 = arith.constant 1 : index
    %404 = memref.load %arg2[%c1_30] : memref<4xf32, #tpu.memory_space<smem>>
    %405 = vector.broadcast %404 : f32 to vector<1x256xf32>
    %406 = arith.addf %403, %405 : vector<1x256xf32>
    %cst_31 = arith.constant 0.000000e+00 : f32
    %407 = vector.broadcast %cst_31 : f32 to vector<1x256xf32>
    %408 = arith.maximumf %406, %407 : vector<1x256xf32>
    %409 = vector.extract_strided_slice %1 {offsets = [1, 0], sizes = [1, 256], strides = [1, 1]} : vector<4x256xf32> to vector<1x256xf32>
    %410 = arith.addf %409, %408 : vector<1x256xf32>
    %cst_32 = arith.constant 0.000000e+00 : f32
    %411 = vector.broadcast %cst_32 : f32 to vector<1x256xf32>
    %c72 = arith.constant 72 : index
    %412 = memref.load %arg1[%c72] : memref<144xf32, #tpu.memory_space<smem>>
    %413 = vector.broadcast %412 : f32 to vector<1x256xf32>
    %414 = arith.mulf %413, %27 : vector<1x256xf32>
    %415 = arith.addf %411, %414 : vector<1x256xf32>
    %c81 = arith.constant 81 : index
    %416 = memref.load %arg1[%c81] : memref<144xf32, #tpu.memory_space<smem>>
    %417 = vector.broadcast %416 : f32 to vector<1x256xf32>
    %418 = arith.mulf %417, %28 : vector<1x256xf32>
    %419 = arith.addf %415, %418 : vector<1x256xf32>
    %c90 = arith.constant 90 : index
    %420 = memref.load %arg1[%c90] : memref<144xf32, #tpu.memory_space<smem>>
    %421 = vector.broadcast %420 : f32 to vector<1x256xf32>
    %422 = arith.mulf %421, %29 : vector<1x256xf32>
    %423 = arith.addf %419, %422 : vector<1x256xf32>
    %c99 = arith.constant 99 : index
    %424 = memref.load %arg1[%c99] : memref<144xf32, #tpu.memory_space<smem>>
    %425 = vector.broadcast %424 : f32 to vector<1x256xf32>
    %426 = arith.mulf %425, %30 : vector<1x256xf32>
    %427 = arith.addf %423, %426 : vector<1x256xf32>
    %c73 = arith.constant 73 : index
    %428 = memref.load %arg1[%c73] : memref<144xf32, #tpu.memory_space<smem>>
    %429 = vector.broadcast %428 : f32 to vector<1x256xf32>
    %430 = arith.mulf %429, %36 : vector<1x256xf32>
    %431 = arith.addf %427, %430 : vector<1x256xf32>
    %c82 = arith.constant 82 : index
    %432 = memref.load %arg1[%c82] : memref<144xf32, #tpu.memory_space<smem>>
    %433 = vector.broadcast %432 : f32 to vector<1x256xf32>
    %434 = arith.mulf %433, %37 : vector<1x256xf32>
    %435 = arith.addf %431, %434 : vector<1x256xf32>
    %c91 = arith.constant 91 : index
    %436 = memref.load %arg1[%c91] : memref<144xf32, #tpu.memory_space<smem>>
    %437 = vector.broadcast %436 : f32 to vector<1x256xf32>
    %438 = arith.mulf %437, %38 : vector<1x256xf32>
    %439 = arith.addf %435, %438 : vector<1x256xf32>
    %c100 = arith.constant 100 : index
    %440 = memref.load %arg1[%c100] : memref<144xf32, #tpu.memory_space<smem>>
    %441 = vector.broadcast %440 : f32 to vector<1x256xf32>
    %442 = arith.mulf %441, %39 : vector<1x256xf32>
    %443 = arith.addf %439, %442 : vector<1x256xf32>
    %c74 = arith.constant 74 : index
    %444 = memref.load %arg1[%c74] : memref<144xf32, #tpu.memory_space<smem>>
    %445 = vector.broadcast %444 : f32 to vector<1x256xf32>
    %446 = arith.mulf %445, %48 : vector<1x256xf32>
    %447 = arith.addf %443, %446 : vector<1x256xf32>
    %c83 = arith.constant 83 : index
    %448 = memref.load %arg1[%c83] : memref<144xf32, #tpu.memory_space<smem>>
    %449 = vector.broadcast %448 : f32 to vector<1x256xf32>
    %450 = arith.mulf %449, %49 : vector<1x256xf32>
    %451 = arith.addf %447, %450 : vector<1x256xf32>
    %c92 = arith.constant 92 : index
    %452 = memref.load %arg1[%c92] : memref<144xf32, #tpu.memory_space<smem>>
    %453 = vector.broadcast %452 : f32 to vector<1x256xf32>
    %454 = arith.mulf %453, %50 : vector<1x256xf32>
    %455 = arith.addf %451, %454 : vector<1x256xf32>
    %c101 = arith.constant 101 : index
    %456 = memref.load %arg1[%c101] : memref<144xf32, #tpu.memory_space<smem>>
    %457 = vector.broadcast %456 : f32 to vector<1x256xf32>
    %458 = arith.mulf %457, %51 : vector<1x256xf32>
    %459 = arith.addf %455, %458 : vector<1x256xf32>
    %c75 = arith.constant 75 : index
    %460 = memref.load %arg1[%c75] : memref<144xf32, #tpu.memory_space<smem>>
    %461 = vector.broadcast %460 : f32 to vector<1x256xf32>
    %462 = arith.mulf %461, %57 : vector<1x256xf32>
    %463 = arith.addf %459, %462 : vector<1x256xf32>
    %c84 = arith.constant 84 : index
    %464 = memref.load %arg1[%c84] : memref<144xf32, #tpu.memory_space<smem>>
    %465 = vector.broadcast %464 : f32 to vector<1x256xf32>
    %466 = arith.mulf %465, %58 : vector<1x256xf32>
    %467 = arith.addf %463, %466 : vector<1x256xf32>
    %c93 = arith.constant 93 : index
    %468 = memref.load %arg1[%c93] : memref<144xf32, #tpu.memory_space<smem>>
    %469 = vector.broadcast %468 : f32 to vector<1x256xf32>
    %470 = arith.mulf %469, %59 : vector<1x256xf32>
    %471 = arith.addf %467, %470 : vector<1x256xf32>
    %c102 = arith.constant 102 : index
    %472 = memref.load %arg1[%c102] : memref<144xf32, #tpu.memory_space<smem>>
    %473 = vector.broadcast %472 : f32 to vector<1x256xf32>
    %474 = arith.mulf %473, %60 : vector<1x256xf32>
    %475 = arith.addf %471, %474 : vector<1x256xf32>
    %c76 = arith.constant 76 : index
    %476 = memref.load %arg1[%c76] : memref<144xf32, #tpu.memory_space<smem>>
    %477 = vector.broadcast %476 : f32 to vector<1x256xf32>
    %478 = arith.mulf %477, %61 : vector<1x256xf32>
    %479 = arith.addf %475, %478 : vector<1x256xf32>
    %c85 = arith.constant 85 : index
    %480 = memref.load %arg1[%c85] : memref<144xf32, #tpu.memory_space<smem>>
    %481 = vector.broadcast %480 : f32 to vector<1x256xf32>
    %482 = arith.mulf %481, %62 : vector<1x256xf32>
    %483 = arith.addf %479, %482 : vector<1x256xf32>
    %c94 = arith.constant 94 : index
    %484 = memref.load %arg1[%c94] : memref<144xf32, #tpu.memory_space<smem>>
    %485 = vector.broadcast %484 : f32 to vector<1x256xf32>
    %486 = arith.mulf %485, %63 : vector<1x256xf32>
    %487 = arith.addf %483, %486 : vector<1x256xf32>
    %c103 = arith.constant 103 : index
    %488 = memref.load %arg1[%c103] : memref<144xf32, #tpu.memory_space<smem>>
    %489 = vector.broadcast %488 : f32 to vector<1x256xf32>
    %490 = arith.mulf %489, %64 : vector<1x256xf32>
    %491 = arith.addf %487, %490 : vector<1x256xf32>
    %c77 = arith.constant 77 : index
    %492 = memref.load %arg1[%c77] : memref<144xf32, #tpu.memory_space<smem>>
    %493 = vector.broadcast %492 : f32 to vector<1x256xf32>
    %494 = arith.mulf %493, %70 : vector<1x256xf32>
    %495 = arith.addf %491, %494 : vector<1x256xf32>
    %c86 = arith.constant 86 : index
    %496 = memref.load %arg1[%c86] : memref<144xf32, #tpu.memory_space<smem>>
    %497 = vector.broadcast %496 : f32 to vector<1x256xf32>
    %498 = arith.mulf %497, %71 : vector<1x256xf32>
    %499 = arith.addf %495, %498 : vector<1x256xf32>
    %c95 = arith.constant 95 : index
    %500 = memref.load %arg1[%c95] : memref<144xf32, #tpu.memory_space<smem>>
    %501 = vector.broadcast %500 : f32 to vector<1x256xf32>
    %502 = arith.mulf %501, %72 : vector<1x256xf32>
    %503 = arith.addf %499, %502 : vector<1x256xf32>
    %c104 = arith.constant 104 : index
    %504 = memref.load %arg1[%c104] : memref<144xf32, #tpu.memory_space<smem>>
    %505 = vector.broadcast %504 : f32 to vector<1x256xf32>
    %506 = arith.mulf %505, %73 : vector<1x256xf32>
    %507 = arith.addf %503, %506 : vector<1x256xf32>
    %c78 = arith.constant 78 : index
    %508 = memref.load %arg1[%c78] : memref<144xf32, #tpu.memory_space<smem>>
    %509 = vector.broadcast %508 : f32 to vector<1x256xf32>
    %510 = arith.mulf %509, %82 : vector<1x256xf32>
    %511 = arith.addf %507, %510 : vector<1x256xf32>
    %c87 = arith.constant 87 : index
    %512 = memref.load %arg1[%c87] : memref<144xf32, #tpu.memory_space<smem>>
    %513 = vector.broadcast %512 : f32 to vector<1x256xf32>
    %514 = arith.mulf %513, %83 : vector<1x256xf32>
    %515 = arith.addf %511, %514 : vector<1x256xf32>
    %c96 = arith.constant 96 : index
    %516 = memref.load %arg1[%c96] : memref<144xf32, #tpu.memory_space<smem>>
    %517 = vector.broadcast %516 : f32 to vector<1x256xf32>
    %518 = arith.mulf %517, %84 : vector<1x256xf32>
    %519 = arith.addf %515, %518 : vector<1x256xf32>
    %c105 = arith.constant 105 : index
    %520 = memref.load %arg1[%c105] : memref<144xf32, #tpu.memory_space<smem>>
    %521 = vector.broadcast %520 : f32 to vector<1x256xf32>
    %522 = arith.mulf %521, %85 : vector<1x256xf32>
    %523 = arith.addf %519, %522 : vector<1x256xf32>
    %c79 = arith.constant 79 : index
    %524 = memref.load %arg1[%c79] : memref<144xf32, #tpu.memory_space<smem>>
    %525 = vector.broadcast %524 : f32 to vector<1x256xf32>
    %526 = arith.mulf %525, %91 : vector<1x256xf32>
    %527 = arith.addf %523, %526 : vector<1x256xf32>
    %c88 = arith.constant 88 : index
    %528 = memref.load %arg1[%c88] : memref<144xf32, #tpu.memory_space<smem>>
    %529 = vector.broadcast %528 : f32 to vector<1x256xf32>
    %530 = arith.mulf %529, %92 : vector<1x256xf32>
    %531 = arith.addf %527, %530 : vector<1x256xf32>
    %c97 = arith.constant 97 : index
    %532 = memref.load %arg1[%c97] : memref<144xf32, #tpu.memory_space<smem>>
    %533 = vector.broadcast %532 : f32 to vector<1x256xf32>
    %534 = arith.mulf %533, %93 : vector<1x256xf32>
    %535 = arith.addf %531, %534 : vector<1x256xf32>
    %c106 = arith.constant 106 : index
    %536 = memref.load %arg1[%c106] : memref<144xf32, #tpu.memory_space<smem>>
    %537 = vector.broadcast %536 : f32 to vector<1x256xf32>
    %538 = arith.mulf %537, %94 : vector<1x256xf32>
    %539 = arith.addf %535, %538 : vector<1x256xf32>
    %c80 = arith.constant 80 : index
    %540 = memref.load %arg1[%c80] : memref<144xf32, #tpu.memory_space<smem>>
    %541 = vector.broadcast %540 : f32 to vector<1x256xf32>
    %542 = arith.mulf %541, %103 : vector<1x256xf32>
    %543 = arith.addf %539, %542 : vector<1x256xf32>
    %c89 = arith.constant 89 : index
    %544 = memref.load %arg1[%c89] : memref<144xf32, #tpu.memory_space<smem>>
    %545 = vector.broadcast %544 : f32 to vector<1x256xf32>
    %546 = arith.mulf %545, %104 : vector<1x256xf32>
    %547 = arith.addf %543, %546 : vector<1x256xf32>
    %c98 = arith.constant 98 : index
    %548 = memref.load %arg1[%c98] : memref<144xf32, #tpu.memory_space<smem>>
    %549 = vector.broadcast %548 : f32 to vector<1x256xf32>
    %550 = arith.mulf %549, %105 : vector<1x256xf32>
    %551 = arith.addf %547, %550 : vector<1x256xf32>
    %c107 = arith.constant 107 : index
    %552 = memref.load %arg1[%c107] : memref<144xf32, #tpu.memory_space<smem>>
    %553 = vector.broadcast %552 : f32 to vector<1x256xf32>
    %554 = arith.mulf %553, %106 : vector<1x256xf32>
    %555 = arith.addf %551, %554 : vector<1x256xf32>
    %c2_33 = arith.constant 2 : index
    %556 = memref.load %arg2[%c2_33] : memref<4xf32, #tpu.memory_space<smem>>
    %557 = vector.broadcast %556 : f32 to vector<1x256xf32>
    %558 = arith.addf %555, %557 : vector<1x256xf32>
    %cst_34 = arith.constant 0.000000e+00 : f32
    %559 = vector.broadcast %cst_34 : f32 to vector<1x256xf32>
    %560 = arith.maximumf %558, %559 : vector<1x256xf32>
    %561 = vector.extract_strided_slice %1 {offsets = [2, 0], sizes = [1, 256], strides = [1, 1]} : vector<4x256xf32> to vector<1x256xf32>
    %562 = arith.addf %561, %560 : vector<1x256xf32>
    %cst_35 = arith.constant 0.000000e+00 : f32
    %563 = vector.broadcast %cst_35 : f32 to vector<1x256xf32>
    %c108 = arith.constant 108 : index
    %564 = memref.load %arg1[%c108] : memref<144xf32, #tpu.memory_space<smem>>
    %565 = vector.broadcast %564 : f32 to vector<1x256xf32>
    %566 = arith.mulf %565, %27 : vector<1x256xf32>
    %567 = arith.addf %563, %566 : vector<1x256xf32>
    %c117 = arith.constant 117 : index
    %568 = memref.load %arg1[%c117] : memref<144xf32, #tpu.memory_space<smem>>
    %569 = vector.broadcast %568 : f32 to vector<1x256xf32>
    %570 = arith.mulf %569, %28 : vector<1x256xf32>
    %571 = arith.addf %567, %570 : vector<1x256xf32>
    %c126 = arith.constant 126 : index
    %572 = memref.load %arg1[%c126] : memref<144xf32, #tpu.memory_space<smem>>
    %573 = vector.broadcast %572 : f32 to vector<1x256xf32>
    %574 = arith.mulf %573, %29 : vector<1x256xf32>
    %575 = arith.addf %571, %574 : vector<1x256xf32>
    %c135 = arith.constant 135 : index
    %576 = memref.load %arg1[%c135] : memref<144xf32, #tpu.memory_space<smem>>
    %577 = vector.broadcast %576 : f32 to vector<1x256xf32>
    %578 = arith.mulf %577, %30 : vector<1x256xf32>
    %579 = arith.addf %575, %578 : vector<1x256xf32>
    %c109 = arith.constant 109 : index
    %580 = memref.load %arg1[%c109] : memref<144xf32, #tpu.memory_space<smem>>
    %581 = vector.broadcast %580 : f32 to vector<1x256xf32>
    %582 = arith.mulf %581, %36 : vector<1x256xf32>
    %583 = arith.addf %579, %582 : vector<1x256xf32>
    %c118 = arith.constant 118 : index
    %584 = memref.load %arg1[%c118] : memref<144xf32, #tpu.memory_space<smem>>
    %585 = vector.broadcast %584 : f32 to vector<1x256xf32>
    %586 = arith.mulf %585, %37 : vector<1x256xf32>
    %587 = arith.addf %583, %586 : vector<1x256xf32>
    %c127 = arith.constant 127 : index
    %588 = memref.load %arg1[%c127] : memref<144xf32, #tpu.memory_space<smem>>
    %589 = vector.broadcast %588 : f32 to vector<1x256xf32>
    %590 = arith.mulf %589, %38 : vector<1x256xf32>
    %591 = arith.addf %587, %590 : vector<1x256xf32>
    %c136 = arith.constant 136 : index
    %592 = memref.load %arg1[%c136] : memref<144xf32, #tpu.memory_space<smem>>
    %593 = vector.broadcast %592 : f32 to vector<1x256xf32>
    %594 = arith.mulf %593, %39 : vector<1x256xf32>
    %595 = arith.addf %591, %594 : vector<1x256xf32>
    %c110 = arith.constant 110 : index
    %596 = memref.load %arg1[%c110] : memref<144xf32, #tpu.memory_space<smem>>
    %597 = vector.broadcast %596 : f32 to vector<1x256xf32>
    %598 = arith.mulf %597, %48 : vector<1x256xf32>
    %599 = arith.addf %595, %598 : vector<1x256xf32>
    %c119 = arith.constant 119 : index
    %600 = memref.load %arg1[%c119] : memref<144xf32, #tpu.memory_space<smem>>
    %601 = vector.broadcast %600 : f32 to vector<1x256xf32>
    %602 = arith.mulf %601, %49 : vector<1x256xf32>
    %603 = arith.addf %599, %602 : vector<1x256xf32>
    %c128 = arith.constant 128 : index
    %604 = memref.load %arg1[%c128] : memref<144xf32, #tpu.memory_space<smem>>
    %605 = vector.broadcast %604 : f32 to vector<1x256xf32>
    %606 = arith.mulf %605, %50 : vector<1x256xf32>
    %607 = arith.addf %603, %606 : vector<1x256xf32>
    %c137 = arith.constant 137 : index
    %608 = memref.load %arg1[%c137] : memref<144xf32, #tpu.memory_space<smem>>
    %609 = vector.broadcast %608 : f32 to vector<1x256xf32>
    %610 = arith.mulf %609, %51 : vector<1x256xf32>
    %611 = arith.addf %607, %610 : vector<1x256xf32>
    %c111 = arith.constant 111 : index
    %612 = memref.load %arg1[%c111] : memref<144xf32, #tpu.memory_space<smem>>
    %613 = vector.broadcast %612 : f32 to vector<1x256xf32>
    %614 = arith.mulf %613, %57 : vector<1x256xf32>
    %615 = arith.addf %611, %614 : vector<1x256xf32>
    %c120 = arith.constant 120 : index
    %616 = memref.load %arg1[%c120] : memref<144xf32, #tpu.memory_space<smem>>
    %617 = vector.broadcast %616 : f32 to vector<1x256xf32>
    %618 = arith.mulf %617, %58 : vector<1x256xf32>
    %619 = arith.addf %615, %618 : vector<1x256xf32>
    %c129 = arith.constant 129 : index
    %620 = memref.load %arg1[%c129] : memref<144xf32, #tpu.memory_space<smem>>
    %621 = vector.broadcast %620 : f32 to vector<1x256xf32>
    %622 = arith.mulf %621, %59 : vector<1x256xf32>
    %623 = arith.addf %619, %622 : vector<1x256xf32>
    %c138 = arith.constant 138 : index
    %624 = memref.load %arg1[%c138] : memref<144xf32, #tpu.memory_space<smem>>
    %625 = vector.broadcast %624 : f32 to vector<1x256xf32>
    %626 = arith.mulf %625, %60 : vector<1x256xf32>
    %627 = arith.addf %623, %626 : vector<1x256xf32>
    %c112 = arith.constant 112 : index
    %628 = memref.load %arg1[%c112] : memref<144xf32, #tpu.memory_space<smem>>
    %629 = vector.broadcast %628 : f32 to vector<1x256xf32>
    %630 = arith.mulf %629, %61 : vector<1x256xf32>
    %631 = arith.addf %627, %630 : vector<1x256xf32>
    %c121 = arith.constant 121 : index
    %632 = memref.load %arg1[%c121] : memref<144xf32, #tpu.memory_space<smem>>
    %633 = vector.broadcast %632 : f32 to vector<1x256xf32>
    %634 = arith.mulf %633, %62 : vector<1x256xf32>
    %635 = arith.addf %631, %634 : vector<1x256xf32>
    %c130 = arith.constant 130 : index
    %636 = memref.load %arg1[%c130] : memref<144xf32, #tpu.memory_space<smem>>
    %637 = vector.broadcast %636 : f32 to vector<1x256xf32>
    %638 = arith.mulf %637, %63 : vector<1x256xf32>
    %639 = arith.addf %635, %638 : vector<1x256xf32>
    %c139 = arith.constant 139 : index
    %640 = memref.load %arg1[%c139] : memref<144xf32, #tpu.memory_space<smem>>
    %641 = vector.broadcast %640 : f32 to vector<1x256xf32>
    %642 = arith.mulf %641, %64 : vector<1x256xf32>
    %643 = arith.addf %639, %642 : vector<1x256xf32>
    %c113 = arith.constant 113 : index
    %644 = memref.load %arg1[%c113] : memref<144xf32, #tpu.memory_space<smem>>
    %645 = vector.broadcast %644 : f32 to vector<1x256xf32>
    %646 = arith.mulf %645, %70 : vector<1x256xf32>
    %647 = arith.addf %643, %646 : vector<1x256xf32>
    %c122 = arith.constant 122 : index
    %648 = memref.load %arg1[%c122] : memref<144xf32, #tpu.memory_space<smem>>
    %649 = vector.broadcast %648 : f32 to vector<1x256xf32>
    %650 = arith.mulf %649, %71 : vector<1x256xf32>
    %651 = arith.addf %647, %650 : vector<1x256xf32>
    %c131 = arith.constant 131 : index
    %652 = memref.load %arg1[%c131] : memref<144xf32, #tpu.memory_space<smem>>
    %653 = vector.broadcast %652 : f32 to vector<1x256xf32>
    %654 = arith.mulf %653, %72 : vector<1x256xf32>
    %655 = arith.addf %651, %654 : vector<1x256xf32>
    %c140 = arith.constant 140 : index
    %656 = memref.load %arg1[%c140] : memref<144xf32, #tpu.memory_space<smem>>
    %657 = vector.broadcast %656 : f32 to vector<1x256xf32>
    %658 = arith.mulf %657, %73 : vector<1x256xf32>
    %659 = arith.addf %655, %658 : vector<1x256xf32>
    %c114 = arith.constant 114 : index
    %660 = memref.load %arg1[%c114] : memref<144xf32, #tpu.memory_space<smem>>
    %661 = vector.broadcast %660 : f32 to vector<1x256xf32>
    %662 = arith.mulf %661, %82 : vector<1x256xf32>
    %663 = arith.addf %659, %662 : vector<1x256xf32>
    %c123 = arith.constant 123 : index
    %664 = memref.load %arg1[%c123] : memref<144xf32, #tpu.memory_space<smem>>
    %665 = vector.broadcast %664 : f32 to vector<1x256xf32>
    %666 = arith.mulf %665, %83 : vector<1x256xf32>
    %667 = arith.addf %663, %666 : vector<1x256xf32>
    %c132 = arith.constant 132 : index
    %668 = memref.load %arg1[%c132] : memref<144xf32, #tpu.memory_space<smem>>
    %669 = vector.broadcast %668 : f32 to vector<1x256xf32>
    %670 = arith.mulf %669, %84 : vector<1x256xf32>
    %671 = arith.addf %667, %670 : vector<1x256xf32>
    %c141 = arith.constant 141 : index
    %672 = memref.load %arg1[%c141] : memref<144xf32, #tpu.memory_space<smem>>
    %673 = vector.broadcast %672 : f32 to vector<1x256xf32>
    %674 = arith.mulf %673, %85 : vector<1x256xf32>
    %675 = arith.addf %671, %674 : vector<1x256xf32>
    %c115 = arith.constant 115 : index
    %676 = memref.load %arg1[%c115] : memref<144xf32, #tpu.memory_space<smem>>
    %677 = vector.broadcast %676 : f32 to vector<1x256xf32>
    %678 = arith.mulf %677, %91 : vector<1x256xf32>
    %679 = arith.addf %675, %678 : vector<1x256xf32>
    %c124 = arith.constant 124 : index
    %680 = memref.load %arg1[%c124] : memref<144xf32, #tpu.memory_space<smem>>
    %681 = vector.broadcast %680 : f32 to vector<1x256xf32>
    %682 = arith.mulf %681, %92 : vector<1x256xf32>
    %683 = arith.addf %679, %682 : vector<1x256xf32>
    %c133 = arith.constant 133 : index
    %684 = memref.load %arg1[%c133] : memref<144xf32, #tpu.memory_space<smem>>
    %685 = vector.broadcast %684 : f32 to vector<1x256xf32>
    %686 = arith.mulf %685, %93 : vector<1x256xf32>
    %687 = arith.addf %683, %686 : vector<1x256xf32>
    %c142 = arith.constant 142 : index
    %688 = memref.load %arg1[%c142] : memref<144xf32, #tpu.memory_space<smem>>
    %689 = vector.broadcast %688 : f32 to vector<1x256xf32>
    %690 = arith.mulf %689, %94 : vector<1x256xf32>
    %691 = arith.addf %687, %690 : vector<1x256xf32>
    %c116 = arith.constant 116 : index
    %692 = memref.load %arg1[%c116] : memref<144xf32, #tpu.memory_space<smem>>
    %693 = vector.broadcast %692 : f32 to vector<1x256xf32>
    %694 = arith.mulf %693, %103 : vector<1x256xf32>
    %695 = arith.addf %691, %694 : vector<1x256xf32>
    %c125 = arith.constant 125 : index
    %696 = memref.load %arg1[%c125] : memref<144xf32, #tpu.memory_space<smem>>
    %697 = vector.broadcast %696 : f32 to vector<1x256xf32>
    %698 = arith.mulf %697, %104 : vector<1x256xf32>
    %699 = arith.addf %695, %698 : vector<1x256xf32>
    %c134 = arith.constant 134 : index
    %700 = memref.load %arg1[%c134] : memref<144xf32, #tpu.memory_space<smem>>
    %701 = vector.broadcast %700 : f32 to vector<1x256xf32>
    %702 = arith.mulf %701, %105 : vector<1x256xf32>
    %703 = arith.addf %699, %702 : vector<1x256xf32>
    %c143 = arith.constant 143 : index
    %704 = memref.load %arg1[%c143] : memref<144xf32, #tpu.memory_space<smem>>
    %705 = vector.broadcast %704 : f32 to vector<1x256xf32>
    %706 = arith.mulf %705, %106 : vector<1x256xf32>
    %707 = arith.addf %703, %706 : vector<1x256xf32>
    %c3_36 = arith.constant 3 : index
    %708 = memref.load %arg2[%c3_36] : memref<4xf32, #tpu.memory_space<smem>>
    %709 = vector.broadcast %708 : f32 to vector<1x256xf32>
    %710 = arith.addf %707, %709 : vector<1x256xf32>
    %cst_37 = arith.constant 0.000000e+00 : f32
    %711 = vector.broadcast %cst_37 : f32 to vector<1x256xf32>
    %712 = arith.maximumf %710, %711 : vector<1x256xf32>
    %713 = vector.extract_strided_slice %1 {offsets = [3, 0], sizes = [1, 256], strides = [1, 1]} : vector<4x256xf32> to vector<1x256xf32>
    %714 = arith.addf %713, %712 : vector<1x256xf32>
    %715 = tpu.concatenate %258, %410, %562, %714 in 0 : vector<1x256xf32>, vector<1x256xf32>, vector<1x256xf32>, vector<1x256xf32> -> vector<4x256xf32>
    %c0_38 = arith.constant 0 : index
    %c0_39 = arith.constant 0 : index
    %c0_40 = arith.constant 0 : index
    %716 = vector.load %arg4[%c0_38, %c0_39, %c0_40] : memref<1x4x256xf32, #tpu.memory_space<vmem>>, vector<1x4x256xf32>
    %717 = vector.shape_cast %716 : vector<1x4x256xf32> to vector<4x256xf32>
    %718 = vector.shape_cast %715 : vector<4x256xf32> to vector<1x4x256xf32>
    tpu.vector_store %arg4[%c0_38, %c0_39, %c0_40], %718 {strides = array<i32>} : memref<1x4x256xf32, #tpu.memory_space<vmem>>, vector<1x4x256xf32>,
    return
  }
  func.func @transform_0(%arg0: i32) -> i32 {
    %c0_i32 = arith.constant 0 : i32
    %c0_i32_0 = arith.constant 0 : i32
    return %c0_i32 : i32
  }
  func.func @transform_1(%arg0: i32) -> i32 {
    %c0_i32 = arith.constant 0 : i32
    %c0_i32_0 = arith.constant 0 : i32
    return %c0_i32 : i32
  }
  func.func @transform_2(%arg0: i32) -> (i32, i32, i32) {
    %c0_i32 = arith.constant 0 : i32
    %c0_i32_0 = arith.constant 0 : i32
    %c0_i32_1 = arith.constant 0 : i32
    return %arg0, %c0_i32, %c0_i32_0 : i32, i32, i32
  }
  func.func @transform_3(%arg0: i32) -> (i32, i32, i32) {
    %c0_i32 = arith.constant 0 : i32
    %c0_i32_0 = arith.constant 0 : i32
    %c0_i32_1 = arith.constant 0 : i32
    return %arg0, %c0_i32, %c0_i32_0 : i32, i32, i32
  }
}

</mosaic_0001>

<bundles_post_ra>
// kernel: tpu_custom_call.1
= control target key start
LH: loop header
LB: loop body
LE: loop exit
PB: predicated region body
PF: predicated region fallthrough
CT: control target
= control target key end

     0   :  { %s3878_s0 = inlined_call_operand.hbm [shape: f32[144], index: 0, kind: input, shape index: {}]   ;;  %s3879_s1 = inlined_call_operand.hbm [shape: f32[4], index: 1, kind: input, shape index: {}]   ;;  %s3880_s2 = inlined_call_operand.hbm [shape: f32[2,4,256], index: 2, kind: input, shape index: {}]   ;;  %s3881_s3 = inlined_call_operand.hbm [shape: f32[2,4,256], index: 3, kind: output, shape index: {}]  }
   0x1   :  { %3893 = sst [smem:[#allocation22_spill]] %s3878_s0 }
   0x2   :  { %3894 = sst [smem:[#allocation23_spill]] %s3879_s1 }
   0x3   :  { %3895 = sst [smem:[#allocation24_spill]] %s3880_s2 }
   0x4   :  { %3896 = sst [smem:[#allocation25_spill]] %s3881_s3 }
   0x5   :  { %8 = vsyncpa [#allocation5], 0 }
   0x6   :  { %9 = vsyncpa [#allocation7], 0 }
   0x7   :  { %10 = vsyncpa [#allocation3], 0 }
   0x8   :  { %12 = vsyncpa [#allocation3 + $0x1], 0 }
   0x9   :  { %13 = vsyncpa [#allocation4], 0 }
   0xa   :  { %15 = vsyncpa [#allocation4 + $0x1], 0  ;;  %s2480_s12 = smov 0   ;;  %s2482_s13 = smov 0  }
   0xb   :  { %s2484_s14 = smov 0   ;;  %s2486_s15 = smov 0  }
   0xc LB: > { %3897 = sst [smem:[#allocation14_spill]] %s2436_s12  ;;  %s2501_s16 = sadd.s32 4294967295, %s2448_s15   ;;  %s2448_s15 = sphi %s2486_s15, %s3933_s15   ;;  %s2444_s14 = sphi %s2484_s14, %s3936_s14   ;;  %s2440_s13 = sphi %s2482_s13, %s3935_s13   ;;  %s2436_s12 = sphi %s2480_s12, %s3934_s12  }
   0xd   : > { %3898 = sst [smem:[#allocation15_spill]] %s2440_s13  ;;  %s2073_s17 = sadd.s32 4294967294, %s2448_s15  }
   0xe   : > { %3899 = sst [smem:[#allocation16_spill]] %s2444_s14  ;;  %p83_p0 = scmp.ne.s32.totalorder %s2440_s13, %s2436_s12 }
   0xf   : > { %3900 = sst [smem:[#allocation17_spill]] %s2448_s15  ;;  %p84_p1 = scmp.eq.s32.totalorder %s2501_s16, 0 }
  0x10   : > { %p107_p2 = scmp.eq.s32.totalorder %s2501_s16, 1  ;;  %p113_p3 = scmp.eq.s32.totalorder %s2073_s17, 1 }
  0x11   : > { %p2510_p4 = por %p84_p1, %p83_p0  ;;  %p2074_p5 = scmp.ge.s32.totalorder %s2448_s15, 1 }
  0x12   : > { %p2515_p6 = por %p113_p3, %p83_p0  ;;  %p120_p7 = scmp.lt.s32.totalorder %s2448_s15, 3 }
  0x13   : > { %s3904_s0 = sld [smem:[#allocation22_spill]]  ;;  %s2536_s27 = sadd.s32 1, %s2448_s15  }
  0x14   : > { %s3902_s19 = scalar_select %p2515_p6, 1, 0 }
  0x15   : > { %p2523_p8 = pnand %p2074_p5, %p120_p7  ;;  %s3906_s1 = sld [smem:[#allocation23_spill]] }
  0x16   : > { %3903 = sst [smem:[#allocation18_spill]] %s3902_s19  ;;  %s67_s28 = ssub.s32 %s2448_s15, %s2536_s27 }
  0x17   : > { %p2251_p10 = pneg %p2523_p8  ;;  %3907 = sst [smem:[#allocation19_spill]] %s2536_s27 }
  0x18   : > { %s2450_s29 = smov [#allocation2]   ;;  %s2451_s30 = smov [#allocation6]  }
  0x19   : > { %s132_s22 = sshll.u32 %s3904_s0, 4  ;;  %p2252_p11 = pnand %p2251_p10, %p84_p1  ;;  %s133_s22 = int_to_ptr.hbm [resolvable:$true] %s132_s22 }
  0x1a   : > { %p68_p12 = scmp.eq.s32.totalorder %s67_s28, 0  ;;  %s70_s4 = sadd.s32 1, %s2444_s14 }
  0x1b   : > { %s142_s26 = sshll.u32 %s3906_s1, 4  ;;  %p77_p13 = scmp.ne.s32.totalorder %s2444_s14, %s2440_s13  ;;  %s143_s26 = int_to_ptr.hbm [resolvable:$true] %s142_s26 }
  0x1c   : > { %2254 = dma.hbm_to_smem (!%p2252_p11), %s133_s22, 32, %s2450_s29, [#allocation5]  }
  0x1d   : > { %2257 = dma.hbm_to_smem (!%p2252_p11), %s143_s26, 16, %s2451_s30, [#allocation7]  }
  0x1e   : > { %p78_p0 = scmp.eq.s32.totalorder %s2448_s15, 0  ;;  %p2549_p5 = por %p107_p2, %p77_p13 }
  0x1f   : > { %s2545_s5 = scalar_select %p68_p12, %s2444_s14, %s70_s4  }
  0x20   : > { %p79_p3 = por %p78_p0, %p77_p13  ;;  %p2268_p7 = scmp.lt.s32.totalorder %s2448_s15, 2 }
  0x21   : > { %3908 = sst [smem:[#allocation20_spill]] %s2545_s5  ;;  %s153_s7 = sand.u32 1, %s2444_s14  }
  0x22   : > { %s3909_s6 = scalar_select %p2549_p5, 1, 0 }
  0x23   : > { %s2078_s8 = sshll.u32 %s153_s7, 3  ;;  %s2237_s9 = sshll.u32 %s2448_s15, 3 }
  0x24   : > { %3910 = sst [smem:[#allocation21_spill]] %s3909_s6  ;;  %s157_s20 = scalar_lea.vmem [#allocation8], %s2078_s8 }
  0x25   : > { %s3911_s2 = sld [smem:[#allocation24_spill]]  ;;  %s166_s21 = sshll.u32 %s157_s20, 4  ;;  %s167_s21 = int_to_ptr.vmem [resolvable:$true] %s166_s21 }
  0x26   : > { %p2559_p10 = pnand %p2268_p7, %p79_p3  ;;  %s154_s25 = scalar_lea.sflag [#allocation3], %s153_s7 }
  0x28   : > { %p2348_p11 = pneg %p2559_p10 }
  0x2b   : > { %s162_s17 = scalar_lea.hbm %s3911_s2, %s2237_s9  ;;  %s2351_s4 = scalar_lea.hbm %s3911_s2, 16 }
  0x2c   : > { %s164_s22 = sshll.u32 %s162_s17, 4  ;;  %s165_s22 = int_to_ptr.hbm [resolvable:$true] %s164_s22 }
  0x2d   : > { %s2344_s26 = sshra.s32 %s165_s22, 4  ;;  %s2345_s26 = int_to_ptr.hbm [resolvable:$true] %s2344_s26 }
  0x2e   : > { %s2346_s28 = scalar_lea.hbm %s2345_s26, 8  ;;  %p2352_p0 = scmp.lt.s32.totalorder %s2345_s26, %s3911_s2 }
  0x2f   : > { %p2347_p2 = scmp.ne.s32.totalorder %s2345_s26, %s2346_s28  ;;  %p2353_p3 = scmp.lt.s32.totalorder %s2351_s4, %s2346_s28 }
  0x31   : > { %p2349_p12 = pnand %p2348_p11, %p2347_p2  ;;  %p2354_p7 = por %p2353_p3, %p2352_p0 }
  0x33   : > { %p2350_p13 = pneg %p2349_p12 }
  0x35   : > { %p2355_p9 = pnand %p2354_p7, %p2350_p13 }
  0x37   : > { %2358 = shalt.err (!%p2355_p9)
}
  0x38   : > { %2261 = dma.hbm_to_vmem [thread:$0]  (!%p2559_p10), %s165_s22, 128, %s167_s21, %s154_s25  }
  0x39   : > { %175 = sbr.rel (%p2523_p8) target bundleno = 463 (0x1cf), region = 32 }
  0x3e   : > { %2419 = dma.done.wait (%p84_p1), [#allocation5], 32  }
  0x3f   : > { %2421 = vsyncadd (%p84_p1), [#allocation5], 4294967264 }
  0x40   : > { %2423 = dma.done.wait (%p84_p1), [#allocation7], 16  }
  0x41   : > { %2425 = vsyncadd (%p84_p1), [#allocation7], 4294967280  ;;  %s2584_s7 = sand.u32 1, %s2440_s13  }
  0x42   : > { %s3882_s23 = sshll.u32 %s2584_s7, 3  ;;  %s188_s10 = scalar_lea.sflag [#allocation3], %s2584_s7 }
  0x43   : > { %s191_s11 = scalar_lea.vmem [#allocation8], %s3882_s23 }
  0x44   : > { %2427 = dma.done.wait (%p2510_p4), %s188_s10, 128  }
  0x45   : > { %2429 = vsyncadd (%p2510_p4), %s188_s10, 4294967168 }
  0x46   : > { %197 = sfence }
  0x47   : > { %v2594_v0 = vld [vmem:[%s191_s11] sm:$0xff]  ;;  %s2452_s17 = smov 17   ;;  %s2453_s20 = smov 16   ;;  %v217_v17 = vlaneseq }
  0x48   : > { %245 = vst [vmem:[#allocation1] ss:$2 sm:$0xff] %v2594_v0  ;;  %s2454_s18 = smov 15   ;;  %s2455_s21 = smov 1  }
  0x49   : > { %s2456_s22 = smov 127   ;;  %s2457_s24 = smov 113   ;;  %v2630_v18 = vand.u32 127, %v217_v17 }
  0x4a   : > { %s2458_s25 = smov 112   ;;  %s2459_s26 = smov 111  }
  0x4b   : > { %s2604_s28 = sld [smem:[#allocation2]]  ;;  %v2641_v20 = vadd.s32 128, %v2630_v18  ;;  %v224_v21 = vand.u32 15, %v2630_v18  ;;  %vm257_vm0 = vcmp.ge.s32.totalorder %v2630_v18, 16  ;;  %vm254_vm2 = vcmp.lt.s32.totalorder %v2630_v18, 17 }
  0x4c   : > { %s2606_s29 = sld [smem:[#allocation2 + $0x9]]  ;;  %vm274_vm5 = vcmp.lt.s32.totalorder %v2630_v18, 16  ;;  %vm288_vm6 = vcmp.lt.s32.totalorder %v2630_v18, 15  ;;  %vm306_vm10 = vcmp.lt.s32.totalorder %v2630_v18, 1  ;;  %vm320_vm11 = vcmp.lt.s32.totalorder %v2630_v18, 127 }
  0x4d   : > { %s2608_s30 = sld [smem:[#allocation2 + $0x12]]  ;;  %v231_v22 = vand.u32 15, %v2641_v20  ;;  %vm2658_vm1 = vcmp.ge.s32.totalorder %v224_v21, 1  ;;  %vm2864_vm7 = vcmp.le.s32.totalorder %v224_v21, 14  ;;  %vm334_vm12 = vcmp.lt.s32.totalorder %v2630_v18, 113 }
  0x4e   : > { %s2610_s4 = sld [smem:[#allocation2 + $0x1b]]  ;;  %vm261_vm4 = vmand %vm257_vm0, %vm2658_vm1  ;;  %vm338_vm13 = vcmp.lt.s32.totalorder %v2641_v20, 240  ;;  %vm352_vm15 = vcmp.lt.s32.totalorder %v2630_v18, 112 }
  0x4f   : > { %v246_v1 = vld.sshfl [vmem:[#allocation1] sm:$0xff pattern:$0x75316420]  ;;  %v247_v2 = vld.sshfl [vmem:[#allocation1 + $0x8] sm:$0xff pattern:$0x75316420]  ;;  %vm2944_vm8 = vmand %vm257_vm0, %vm2864_vm7 }
  0x50   : > { %250 = vrot.lane.b32.xlu0 %v246_v1, %s2452_s17  ;;  %265 = vst [vmem:[#allocation1] ss:$2 sm:$0xff] %v2594_v0  ;;  %s2612_s8 = sld [smem:[#allocation2 + $0x24]]  ;;  %vm2671_vm3 = vcmp.ge.s32.totalorder %v231_v22, 1  ;;  %vm2957_vm9 = vcmp.le.s32.totalorder %v231_v22, 14 }
  0x51   : > { %s2614_s9 = sld [smem:[#allocation2 + $0x2d]]  ;;  %v374_v28 = vstv %s2604_s28  ;;  %vm3250_vm14 = vmand %vm338_vm13, %vm2671_vm3 }
  0x52   : > { %s2616_s10 = sld [smem:[#allocation2 + $0x36]]  ;;  %v380_v29 = vstv %s2606_s29 }
  0x53   : > { %s2618_s11 = sld [smem:[#allocation2 + $0x3f]]  ;;  %v392_v32 = vstv %s2608_s30 }
  0x54   : > { %s2638_s23 = sld [smem:[#allocation2 + $0x1]]  ;;  %v404_v33 = vstv %s2610_s4 }
  0x55   : > { %s2643_s0 = sld [smem:[#allocation2 + $0xa]] }
  0x56   : > { %s2646_s1 = sld [smem:[#allocation2 + $0x13]]  ;;  %v763_v34 = vstv %s2612_s8 }
  0x57   : > { %v266_v3 = vld.sshfl [vmem:[#allocation1] sm:$0xff pattern:$0x75316420]  ;;  %v267_v4 = vld.sshfl [vmem:[#allocation1 + $0x8] sm:$0xff pattern:$0x75316420]  ;;  %v769_v35 = vstv %s2614_s9 }
  0x58   : > { %252 = vrot.lane.b32.xlu0 %v247_v2, %s2452_s17  ;;  %270 = vrot.lane.b32.xlu1 %v266_v3, %s2453_s20  ;;  %279 = vst [vmem:[#allocation1] ss:$2 sm:$0xff] %v2594_v0  ;;  %s2620_s17 = sld [smem:[#allocation2 + $0x48]]  ;;  %v781_v36 = vstv %s2616_s10 }
  0x59   : > { %s2648_s2 = sld [smem:[#allocation2 + $0x1c]]  ;;  %v793_v37 = vstv %s2618_s11 }
  0x5a   : > { %s2650_s5 = sld [smem:[#allocation2 + $0x25]]  ;;  %v416_v48 = vstv %s2638_s23 }
  0x5b   : > { %s2653_s14 = sld [smem:[#allocation2 + $0x2e]]  ;;  %v422_v49 = vstv %s2643_s0 }
  0x5c   : > { %s2662_s13 = sld [smem:[#allocation2 + $0x37]]  ;;  %v434_v50 = vstv %s2646_s1 }
  0x5d   : > { %s2665_s27 = sld [smem:[#allocation2 + $0x40]] }
  0x5e   : > { %s2667_s15 = sld [smem:[#allocation2 + $0x49]]  ;;  %v1152_v38 = vstv %s2620_s17 }
  0x5f   : > { %v280_v5 = vld.sshfl [vmem:[#allocation1] sm:$0xff pattern:$0x75316420]  ;;  %v281_v6 = vld.sshfl [vmem:[#allocation1 + $0x8] sm:$0xff pattern:$0x75316420]  ;;  %v446_v51 = vstv %s2648_s2 }
  0x60   : > { %272 = vrot.lane.b32.xlu1 %v267_v4, %s2453_s20  ;;  %284 = vrot.lane.b32.xlu2 %v280_v5, %s2454_s18  ;;  %297 = vst [vmem:[#allocation1] ss:$2 sm:$0xff] %v2594_v0  ;;  %s2622_s20 = sld [smem:[#allocation2 + $0x51]]  ;;  %v805_v53 = vstv %s2650_s5 }
  0x61   : > { %s2679_s19 = sld [smem:[#allocation2 + $0x52]]  ;;  %v811_v54 = vstv %s2653_s14 }
  0x62   : > { %s2681_s12 = sld [smem:[#allocation2 + $0x5b]]  ;;  %v823_v55 = vstv %s2662_s13 }
  0x63   : > { %s2683_s6 = sld [smem:[#allocation2 + $0x64]]  ;;  %v835_v56 = vstv %s2665_s27 }
  0x64   : > { %s2693_s3 = sld [smem:[#allocation2 + $0x6d]]  ;;  %v1194_v60 = vstv %s2667_s15 }
  0x65   : > { %s2699_s28 = sld [smem:[#allocation2 + $0x76]] }
  0x66   : > { %v1158_v39 = vstv %s2622_s20  ;;  %s2705_s29 = sld [smem:[#allocation2 + $0x7f]] }
  0x67   : > { %v299_v7 = vld.sshfl [vmem:[#allocation1 + $0x8] sm:$0xff pattern:$0x75316420]  ;;  %v298_v8 = vld.sshfl [vmem:[#allocation1] sm:$0xff pattern:$0x75316420]  ;;  %v1200_v63 = vstv %s2679_s19 }
  0x68   : > { %304 = vrot.lane.b32.xlu1 %v299_v7, %s2455_s21  ;;  %302 = vrot.lane.b32.xlu0 %v298_v8, %s2455_s21  ;;  %311 = vst [vmem:[#allocation1] ss:$2 sm:$0xff] %v2594_v0  ;;  %s2626_s21 = sld [smem:[#allocation2 + $0x63]]  ;;  %v1212_v1 = vstv %s2681_s12 }
  0x69   : > { %286 = vrot.lane.b32.xlu2 %v281_v6, %s2454_s18  ;;  %s2624_s18 = sld [smem:[#allocation2 + $0x5a]]  ;;  %v1224_v5 = vstv %s2683_s6 }
  0x6a   : > { %s2725_s30 = sld [smem:[#allocation2 + $0x88]]  ;;  %v1583_v7 = vstv %s2693_s3 }
  0x6b   : > { %v1589_v8 = vstv %s2699_s28  ;;  %s2852_s0 = sld [smem:[#allocation2 + $0x2]] }
  0x6c   : > { %s2857_s1 = sld [smem:[#allocation2 + $0xb]] }
  0x6d   : > { %s2859_s2 = sld [smem:[#allocation2 + $0x14]] }
  0x6e   : > { %v1182_v41 = vstv %s2626_s21  ;;  %s2868_s14 = sld [smem:[#allocation2 + $0x1d]] }
  0x6f   : > { %v312_v9 = vld.sshfl [vmem:[#allocation1] sm:$0xff pattern:$0x75316420]  ;;  %v313_v10 = vld.sshfl [vmem:[#allocation1 + $0x8] sm:$0xff pattern:$0x75316420]  ;;  %v1170_v40 = vstv %s2624_s18 }
  0x70   : > { %318 = vrot.lane.b32.xlu0 %v313_v10, %s2456_s22  ;;  %325 = vst [vmem:[#allocation1] ss:$2 sm:$0xff] %v2594_v0  ;;  %s2882_s15 = sld [smem:[#allocation2 + $0x26]] }
  0x71   : > { %316 = vrot.lane.b32.xlu2 %v312_v9, %s2456_s22  ;;  %s2628_s22 = sld [smem:[#allocation2 + $0x6c]]  ;;  %v1601_v9 = vstv %s2705_s29 }
  0x72   : > { %s2893_s3 = sld [smem:[#allocation2 + $0x2f]] }
  0x73   : > { %s2903_s19 = sld [smem:[#allocation2 + $0x38]] }
  0x74   : > { %s2908_s13 = sld [smem:[#allocation2 + $0x41]] }
  0x75   : > { %s2910_s5 = sld [smem:[#allocation2 + $0x4a]] }
  0x76   : > { %s2918_s12 = sld [smem:[#allocation2 + $0x53]] }
  0x77   : > { %v326_v11 = vld.sshfl [vmem:[#allocation1] sm:$0xff pattern:$0x75316420]  ;;  %v327_v12 = vld.sshfl [vmem:[#allocation1 + $0x8] sm:$0xff pattern:$0x75316420]  ;;  %v1541_v44 = vstv %s2628_s22 }
  0x78   : > { %330 = vrot.lane.b32.xlu1 %v326_v11, %s2457_s24  ;;  %343 = vst [vmem:[#allocation1] ss:$2 sm:$0xff] %v2594_v0  ;;  %s2926_s27 = sld [smem:[#allocation2 + $0x5c]] }
  0x79   : > { %332 = vrot.lane.b32.xlu2 %v327_v12, %s2457_s24  ;;  %s2632_s24 = sld [smem:[#allocation2 + $0x75]] }
  0x7a   : > { %s2928_s6 = sld [smem:[#allocation2 + $0x65]] }
  0x7b   : > { %s2930_s23 = sld [smem:[#allocation2 + $0x6e]] }
  0x7c   : > { %s2935_s4 = sld [smem:[#allocation2 + $0x77]] }
  0x7d   : > { %s2948_s8 = sld [smem:[#allocation2 + $0x80]] }
  0x7e   : > { %s2961_s9 = sld [smem:[#allocation2 + $0x89]] }
  0x7f   : > { %v345_v13 = vld.sshfl [vmem:[#allocation1 + $0x8] sm:$0xff pattern:$0x75316420]  ;;  %v344_v14 = vld.sshfl [vmem:[#allocation1] sm:$0xff pattern:$0x75316420]  ;;  %v1547_v45 = vstv %s2632_s24 }
  0x80   : > { %350 = vrot.lane.b32.xlu1 %v345_v13, %s2458_s25  ;;  %348 = vrot.lane.b32.xlu0 %v344_v14, %s2458_s25  ;;  %357 = vst [vmem:[#allocation1] ss:$2 sm:$0xff] %v2594_v0  ;;  %s2634_s25 = sld [smem:[#allocation2 + $0x7e]] }
  0x81   : > { %s2968_s10 = sld [smem:[#allocation2 + $0x3]] }
  0x82   : > { %s3020_s11 = sld [smem:[#allocation2 + $0xc]] }
  0x83   : > { %s3026_s17 = sld [smem:[#allocation2 + $0x15]] }
  0x84   : > { %s3029_s20 = sld [smem:[#allocation2 + $0x1e]] }
  0x85   : > { %s3032_s18 = sld [smem:[#allocation2 + $0x27]] }
  0x86   : > { %v1559_v46 = vstv %s2634_s25  ;;  %s3036_s21 = sld [smem:[#allocation2 + $0x30]] }
  0x87   : > { %v359_v15 = vld.sshfl [vmem:[#allocation1 + $0x8] sm:$0xff pattern:$0x75316420]  ;;  %v358_v16 = vld.sshfl [vmem:[#allocation1] sm:$0xff pattern:$0x75316420] }
  0x88   : > { %364 = vrot.lane.b32.xlu0 %v359_v15, %s2459_s26  ;;  %362 = vrot.lane.b32.xlu2 %v358_v16, %s2459_s26  ;;  %s2636_s26 = sld [smem:[#allocation2 + $0x87]] }
  0x89   : > { %s3041_s22 = sld [smem:[#allocation2 + $0x39]] }
  0x8a   : > { %s3045_s24 = sld [smem:[#allocation2 + $0x42]] }
  0x8b   : > { %s3054_s25 = sld [smem:[#allocation2 + $0x4b]] }
  0x8c   : > { %s3068_s28 = sld [smem:[#allocation2 + $0x5d]] }
  0x8d   : > { %s3073_s29 = sld [smem:[#allocation2 + $0x66]] }
  0x8e   : > { %v1571_v47 = vstv %s2636_s26  ;;  %s3060_s26 = sld [smem:[#allocation2 + $0x54]] }
  0xc2   : > { %v251_v19 = vpop.permute.xlu0 %250 }
  0xca   : > { %v253_v25 = vpop.permute.xlu0 %252  ;;  %v2719_v52 = vpop.permute.xlu1 %270 }
  0xcb   : > { %v255_v26 = vsel %vm254_vm2, %v251_v19, %v253_v25  ;;  %v256_v27 = vsel %vm254_vm2, %v253_v25, %v251_v19  ;;  %vm758_vm2 = vcmask 1043456  }
  0xcc   : > { %v2687_v30 = vsel %vm261_vm4, %v256_v27, 0.0  ;;  %v2691_v31 = vsel %vm2671_vm3, %v255_v26, 0.0  ;;  %vm1952_vm4 = vcmask 1041408  }
  0xcd   : > { %v381_v42 = vmul.f32 %v380_v29, %v2687_v30  ;;  %v382_v43 = vmul.f32 %v380_v29, %v2691_v31  ;;  %v393_v59 = vmul.f32 %v392_v32, %v2687_v30  ;;  %v770_v61 = vmul.f32 %v769_v35, %v2687_v30 }
  0xce   : > { %v771_v62 = vmul.f32 %v769_v35, %v2691_v31  ;;  %v375_v2 = vmul.f32 %v374_v28, %v2687_v30  ;;  %v376_v3 = vmul.f32 %v374_v28, %v2691_v31  ;;  %v394_v4 = vmul.f32 %v392_v32, %v2691_v31 }
  0xcf   : > { %v385_v57 = vrot.slane %v381_v42, 1  ;;  %v386_v58 = vrot.slane %v382_v43, 1  ;;  %v405_v6 = vmul.f32 %v404_v33, %v2687_v30  ;;  %v397_v12 = vrot.slane %v393_v59, 2 }
  0xd0   : > { %v406_v13 = vmul.f32 %v404_v33, %v2691_v31  ;;  %v774_v14 = vrot.slane %v770_v61, 1  ;;  %v775_v15 = vrot.slane %v771_v62, 1  ;;  %v782_v16 = vmul.f32 %v781_v36, %v2687_v30 }
  0xd1   : > { %v389_v10 = vadd.f32 %v385_v57, %v375_v2  ;;  %v390_v11 = vadd.f32 %v386_v58, %v376_v3  ;;  %v1159_v17 = vmul.f32 %v1158_v39, %v2687_v30  ;;  %v398_v19 = vrot.slane %v394_v4, 2 }
  0xd2   : > { %v783_v25 = vmul.f32 %v781_v36, %v2691_v31  ;;  %v794_v26 = vmul.f32 %v793_v37, %v2687_v30  ;;  %v1160_v27 = vmul.f32 %v1158_v39, %v2691_v31  ;;  %v409_v28 = vrot.slane %v405_v6, 3  ;;  %v273_v39 = vpop.permute.xlu1 %272 }
  0xd3   : > { %v764_v29 = vmul.f32 %v763_v34, %v2687_v30  ;;  %v765_v32 = vmul.f32 %v763_v34, %v2691_v31  ;;  %v1613_v33 = vstv %s2725_s30  ;;  %v401_v35 = vadd.f32 %v397_v12, %v389_v10  ;;  %s3077_s30 = sld [smem:[#allocation2 + $0x6f]] }
  0xd4   : > { %v402_v42 = vadd.f32 %v398_v19, %v390_v11  ;;  %v410_v43 = vrot.slane %v406_v13, 3  ;;  %v795_v57 = vmul.f32 %v793_v37, %v2691_v31  ;;  %v786_v59 = vrot.slane %v782_v16, 2 }
  0xd5   : > { %v778_v36 = vadd.f32 %v774_v14, %v764_v29  ;;  %v779_v58 = vadd.f32 %v775_v15, %v765_v32  ;;  %v1163_v61 = vrot.slane %v1159_v17, 1  ;;  %v787_v62 = vrot.slane %v783_v25, 2 }
  0xd6   : > { %v798_v2 = vrot.slane %v794_v26, 3  ;;  %v1164_v3 = vrot.slane %v1160_v27, 1  ;;  %v1548_v34 = vmul.f32 %v1547_v45, %v2687_v30  ;;  %v1153_v4 = vmul.f32 %v1152_v38, %v2687_v30 }
  0xd7   : > { %v1171_v6 = vmul.f32 %v1170_v40, %v2687_v30  ;;  %v1172_v37 = vmul.f32 %v1170_v40, %v2691_v31  ;;  %v1549_v10 = vmul.f32 %v1547_v45, %v2691_v31  ;;  %v413_v11 = vadd.f32 %v409_v28, %v401_v35 }
  0xd8   : > { %v799_v12 = vrot.slane %v795_v57, 3  ;;  %v1154_v13 = vmul.f32 %v1152_v38, %v2691_v31  ;;  %v276_v14 = vsel %vm274_vm5, %v273_v39, %v2719_v52  ;;  %v414_v15 = vadd.f32 %v410_v43, %v402_v42 }
  0xd9   : > { %v790_v16 = vadd.f32 %v786_v59, %v778_v36  ;;  %v791_v17 = vadd.f32 %v787_v62, %v779_v58  ;;  %v1167_v40 = vadd.f32 %v1163_v61, %v1153_v4  ;;  %v1183_v19 = vmul.f32 %v1182_v41, %v2687_v30 }
  0xda   : > { %v1168_v45 = vadd.f32 %v1164_v3, %v1154_v13  ;;  %v1552_v25 = vrot.slane %v1548_v34, 1  ;;  %v2774_v38 = vsel %vm257_vm0, %v276_v14, 0.0  ;;  %v1175_v26 = vrot.slane %v1171_v6, 2 }
  0xdb   : > { %v1176_v27 = vrot.slane %v1172_v37, 2  ;;  %v1184_v28 = vmul.f32 %v1182_v41, %v2691_v31  ;;  %v1553_v29 = vrot.slane %v1549_v10, 1  ;;  %v1542_v32 = vmul.f32 %v1541_v44, %v2687_v30 }
  0xdc   : > { %v1543_v35 = vmul.f32 %v1541_v44, %v2691_v31  ;;  %v1560_v42 = vmul.f32 %v1559_v46, %v2687_v30  ;;  %v2791_v43 = vsel %vm274_vm5, %v2719_v52, %v273_v39  ;;  %v1179_v57 = vadd.f32 %v1175_v26, %v1167_v40 }
  0xdd   : > { %v1561_v41 = vmul.f32 %v1559_v46, %v2691_v31  ;;  %v417_v36 = vmul.f32 %v416_v48, %v2774_v38  ;;  %v423_v58 = vmul.f32 %v422_v49, %v2774_v38  ;;  %v1180_v44 = vadd.f32 %v1176_v27, %v1168_v45 }
  0xde   : > { %v1556_v59 = vadd.f32 %v1552_v25, %v1542_v32  ;;  %v1572_v61 = vmul.f32 %v1571_v47, %v2687_v30  ;;  %v1573_v52 = vmul.f32 %v1571_v47, %v2691_v31  ;;  %v802_v39 = vadd.f32 %v798_v2, %v790_v16 }
  0xdf   : > { %v1187_v62 = vrot.slane %v1183_v19, 3  ;;  %v1557_v3 = vadd.f32 %v1553_v29, %v1543_v35  ;;  %v418_v46 = vmul.f32 %v416_v48, %v2791_v43  ;;  %v803_v34 = vadd.f32 %v799_v12, %v791_v17 }
  0xe0   : > { %v1188_v4 = vrot.slane %v1184_v28, 3  ;;  %v1564_v6 = vrot.slane %v1560_v42, 2  ;;  %v424_v37 = vmul.f32 %v422_v49, %v2791_v43  ;;  %v1565_v10 = vrot.slane %v1561_v41, 2 }
  0xe1   : > { %v1191_v30 = vadd.f32 %v1187_v62, %v1179_v57  ;;  %v419_v31 = vadd.f32 %v417_v36, %v413_v11  ;;  %v427_v47 = vrot.slane %v423_v58, 1  ;;  %v1576_v12 = vrot.slane %v1572_v61, 3  ;;  %v2854_v57 = vpop.permute.xlu2 %284 }
  0xe2   : > { %v1192_v2 = vadd.f32 %v1188_v4, %v1180_v44  ;;  %v1568_v48 = vadd.f32 %v1564_v6, %v1556_v59  ;;  %v1577_v13 = vrot.slane %v1573_v52, 3  ;;  %v1569_v14 = vadd.f32 %v1565_v10, %v1557_v3 }
  0xe3   : > { %v420_v16 = vadd.f32 %v418_v46, %v414_v15  ;;  %v435_v49 = vmul.f32 %v434_v50, %v2774_v38  ;;  %v436_v17 = vmul.f32 %v434_v50, %v2791_v43  ;;  %v428_v11 = vrot.slane %v424_v37, 1 }
  0xe4   : > { %v447_v40 = vmul.f32 %v446_v51, %v2774_v38  ;;  %v2826_v45 = vmul.f32 %v446_v51, %v2791_v43  ;;  %v806_v19 = vmul.f32 %v805_v53, %v2774_v38  ;;  %v431_v25 = vadd.f32 %v427_v47, %v419_v31 }
  0xe5   : > { %v807_v15 = vmul.f32 %v805_v53, %v2791_v43  ;;  %v812_v26 = vmul.f32 %v811_v54, %v2774_v38  ;;  %v813_v50 = vmul.f32 %v811_v54, %v2791_v43  ;;  %v1195_v27 = vmul.f32 %v1194_v60, %v2774_v38 }
  0xe6   : > { %v1196_v51 = vmul.f32 %v1194_v60, %v2791_v43  ;;  %v1201_v28 = vmul.f32 %v1200_v63, %v2774_v38  ;;  %v1202_v29 = vmul.f32 %v1200_v63, %v2791_v43  ;;  %v1580_v32 = vadd.f32 %v1576_v12, %v1568_v48 }
  0xe7   : > { %v1581_v53 = vadd.f32 %v1577_v13, %v1569_v14  ;;  %v439_v35 = vrot.slane %v435_v49, 2  ;;  %v440_v42 = vrot.slane %v436_v17, 2  ;;  %v432_v54 = vadd.f32 %v428_v11, %v420_v16 }
  0xe8   : > { %v451_v41 = vrot.slane %v447_v40, 3  ;;  %v452_v36 = vrot.slane %v2826_v45, 3  ;;  %v808_v60 = vadd.f32 %v806_v19, %v802_v39  ;;  %v809_v58 = vadd.f32 %v807_v15, %v803_v34 }
  0xe9   : > { %v443_v63 = vadd.f32 %v439_v35, %v431_v25  ;;  %v816_v44 = vrot.slane %v812_v26, 1  ;;  %v817_v59 = vrot.slane %v813_v50, 1  ;;  %v1197_v61 = vadd.f32 %v1195_v27, %v1191_v30 }
  0xea   : > { %v1198_v52 = vadd.f32 %v1196_v51, %v1192_v2  ;;  %v1205_v62 = vrot.slane %v1201_v28, 1  ;;  %v1206_v3 = vrot.slane %v1202_v29, 1  ;;  %v1584_v46 = vmul.f32 %v1583_v7, %v2774_v38 }
  0xeb   : > { %v1585_v34 = vmul.f32 %v1583_v7, %v2791_v43  ;;  %v1590_v4 = vmul.f32 %v1589_v8, %v2774_v38  ;;  %v1591_v6 = vmul.f32 %v1589_v8, %v2791_v43  ;;  %v444_v21 = vadd.f32 %v440_v42, %v432_v54 }
  0xec   : > { %v824_v37 = vmul.f32 %v823_v55, %v2774_v38  ;;  %v825_v30 = vmul.f32 %v823_v55, %v2791_v43  ;;  %v836_v10 = vmul.f32 %v835_v56, %v2774_v38  ;;  %v2895_v7 = vadd.f32 %v451_v41, %v443_v63 }
  0xed   : > { %v820_v31 = vadd.f32 %v816_v44, %v808_v60  ;;  %v1213_v8 = vmul.f32 %v1212_v1, %v2774_v38  ;;  %v1214_v47 = vmul.f32 %v1212_v1, %v2791_v43  ;;  %v821_v2 = vadd.f32 %v817_v59, %v809_v58 }
  0xee   : > { %v837_v55 = vmul.f32 %v835_v56, %v2791_v43  ;;  %v1209_v48 = vadd.f32 %v1205_v62, %v1197_v61  ;;  %v1210_v12 = vadd.f32 %v1206_v3, %v1198_v52  ;;  %v1586_v13 = vadd.f32 %v1584_v46, %v1580_v32 }
  0xef   : > { %v1587_v14 = vadd.f32 %v1585_v34, %v1581_v53  ;;  %v1594_v16 = vrot.slane %v1590_v4, 1  ;;  %v1595_v49 = vrot.slane %v1591_v6, 1  ;;  %v828_v17 = vrot.slane %v824_v37, 2 }
  0xf0   : > { %v829_v1 = vrot.slane %v825_v30, 2  ;;  %v1225_v11 = vmul.f32 %v1224_v5, %v2774_v38  ;;  %v1226_v56 = vmul.f32 %v1224_v5, %v2791_v43  ;;  %v1217_v40 = vrot.slane %v1213_v8, 2  ;;  %v287_v5 = vpop.permute.xlu2 %286 }
  0xf1   : > { %v1218_v45 = vrot.slane %v1214_v47, 2  ;;  %v1602_v19 = vmul.f32 %v1601_v9, %v2774_v38  ;;  %v1603_v25 = vmul.f32 %v1601_v9, %v2791_v43  ;;  %v456_v15 = vadd.f32 %v452_v36, %v444_v21 }
  0xf2   : > { %v832_v26 = vadd.f32 %v828_v17, %v820_v31  ;;  %v833_v50 = vadd.f32 %v829_v1, %v821_v2  ;;  %v840_v27 = vrot.slane %v836_v10, 3  ;;  %v1221_v51 = vadd.f32 %v1217_v40, %v1209_v48 }
  0xf3   : > { %v1222_v28 = vadd.f32 %v1218_v45, %v1210_v12  ;;  %v1598_v29 = vadd.f32 %v1594_v16, %v1586_v13  ;;  %v1599_v32 = vadd.f32 %v1595_v49, %v1587_v14  ;;  %v841_v53 = vrot.slane %v837_v55, 3 }
  0xf4   : > { %v1229_v35 = vrot.slane %v1225_v11, 3  ;;  %v1230_v9 = vrot.slane %v1226_v56, 3  ;;  %v1614_v42 = vmul.f32 %v1613_v33, %v2774_v38  ;;  %v1606_v54 = vrot.slane %v1602_v19, 2 }
  0xf5   : > { %v1607_v41 = vrot.slane %v1603_v25, 2  ;;  %v1615_v36 = vmul.f32 %v1613_v33, %v2791_v43  ;;  %v290_v38 = vsel %vm288_vm6, %v287_v5, %v2854_v57  ;;  %v844_v63 = vadd.f32 %v840_v27, %v832_v26 }
  0xf6   : > { %v2953_v58 = vadd.f32 %v841_v53, %v833_v50  ;;  %v289_v43 = vsel %vm288_vm6, %v2854_v57, %v287_v5  ;;  %v1233_v44 = vadd.f32 %v1229_v35, %v1221_v51  ;;  %v2966_v59 = vadd.f32 %v1230_v9, %v1222_v28 }
  0xf7   : > { %v1610_v61 = vadd.f32 %v1606_v54, %v1598_v29  ;;  %v1611_v52 = vadd.f32 %v1607_v41, %v1599_v32  ;;  %v1618_v22 = vrot.slane %v1614_v42, 3  ;;  %v458_v62 = vstv %s2852_s0  ;;  %s3082_s0 = sld [smem:[#allocation2 + $0x78]] }
  0xf8   : > { %v464_v3 = vstv %s2857_s1  ;;  %v2974_v46 = vsel %vm2944_vm8, %v290_v38, 0.0  ;;  %v1619_v34 = vrot.slane %v1615_v36, 3  ;;  %v476_v57 = vstv %s2859_s2  ;;  %s3089_s1 = sld [smem:[#allocation2 + $0x81]] }
  0xf9   : > { %v488_v4 = vstv %s2868_s14  ;;  %v2980_v6 = vsel %vm2957_vm9, %v289_v43, 0.0  ;;  %v847_v21 = vstv %s2882_s15  ;;  %v853_v37 = vstv %s2893_s3  ;;  %s3132_s2 = sld [smem:[#allocation2 + $0x4]] }
  0xfa   : > { %v865_v30 = vstv %s2903_s19  ;;  %v877_v10 = vstv %s2908_s13  ;;  %v2986_v31 = vadd.f32 %v1618_v22, %v1610_v61  ;;  %v2988_v8 = vadd.f32 %v1619_v34, %v1611_v52  ;;  %s3142_s14 = sld [smem:[#allocation2 + $0xd]] }
  0xfb   : > { %v459_v47 = vmul.f32 %v458_v62, %v2974_v46  ;;  %v465_v2 = vmul.f32 %v464_v3, %v2974_v46  ;;  %v1236_v55 = vstv %s2910_s5  ;;  %v460_v48 = vmul.f32 %v458_v62, %v2980_v6  ;;  %s3152_s15 = sld [smem:[#allocation2 + $0x16]] }
  0xfc   : > { %v466_v12 = vmul.f32 %v464_v3, %v2980_v6  ;;  %v477_v13 = vmul.f32 %v476_v57, %v2974_v46  ;;  %v1242_v14 = vstv %s2918_s12  ;;  %v1254_v16 = vstv %s2926_s27  ;;  %s3155_s3 = sld [smem:[#allocation2 + $0x1f]] }
  0xfd   : > { %v461_v49 = vadd.f32 %v459_v47, %v2895_v7  ;;  %v478_v17 = vmul.f32 %v476_v57, %v2980_v6  ;;  %v1266_v1 = vstv %s2928_s6  ;;  %v1625_v11 = vstv %s2930_s23  ;;  %s3162_s19 = sld [smem:[#allocation2 + $0xe]] }
  0xfe   : > { %v1631_v56 = vstv %s2935_s4  ;;  %v462_v40 = vadd.f32 %v460_v48, %v456_v15  ;;  %v1643_v45 = vstv %s2948_s8  ;;  %v1655_v19 = vstv %s2961_s9  ;;  %s3180_s13 = sld [smem:[#allocation2 + $0x5]] }
  0xff   : > { %v469_v25 = vrot.slane %v465_v2, 1  ;;  %v500_v26 = vstv %s2968_s10  ;;  %v470_v50 = vrot.slane %v466_v12, 1  ;;  %v481_v27 = vrot.slane %v477_v13, 2  ;;  %s3202_s5 = sld [smem:[#allocation2 + $0x17]] }
 0x100   : > { %v3007_v5 = vmul.f32 %v488_v4, %v2974_v46  ;;  %v3010_v51 = vmul.f32 %v488_v4, %v2980_v6  ;;  %v482_v7 = vrot.slane %v478_v17, 2  ;;  %v848_v29 = vmul.f32 %v847_v21, %v2974_v46  ;;  %s3210_s12 = sld [smem:[#allocation2 + $0x20]] }
 0x101   : > { %v473_v28 = vadd.f32 %v469_v25, %v461_v49  ;;  %v854_v32 = vmul.f32 %v853_v37, %v2974_v46  ;;  %v474_v53 = vadd.f32 %v470_v50, %v462_v40  ;;  %v849_v15 = vmul.f32 %v847_v21, %v2980_v6  ;;  %s3229_s27 = sld [smem:[#allocation2 + $0xf]] }
 0x102   : > { %v855_v35 = vmul.f32 %v853_v37, %v2980_v6  ;;  %v866_v9 = vmul.f32 %v865_v30, %v2974_v46  ;;  %v850_v42 = vadd.f32 %v848_v29, %v844_v63  ;;  %v867_v54 = vmul.f32 %v865_v30, %v2980_v6  ;;  %s3231_s6 = sld [smem:[#allocation2 + $0x6]] }
 0x103   : > { %v1237_v41 = vmul.f32 %v1236_v55, %v2974_v46  ;;  %v1243_v36 = vmul.f32 %v1242_v14, %v2974_v46  ;;  %v493_v60 = vrot.slane %v3007_v5, 3  ;;  %v494_v38 = vrot.slane %v3010_v51, 3  ;;  %s3256_s23 = sld [smem:[#allocation2 + $0x18]] }
 0x104   : > { %v1238_v43 = vmul.f32 %v1236_v55, %v2980_v6  ;;  %v1244_v61 = vmul.f32 %v1242_v14, %v2980_v6  ;;  %v485_v52 = vadd.f32 %v481_v27, %v473_v28  ;;  %v851_v63 = vadd.f32 %v849_v15, %v2953_v58  ;;  %s3270_s4 = sld [smem:[#allocation2 + $0x21]] }
 0x105   : > { %v858_v22 = vrot.slane %v854_v32, 1  ;;  %v1239_v62 = vadd.f32 %v1237_v41, %v1233_v44  ;;  %v486_v3 = vadd.f32 %v482_v7, %v474_v53  ;;  %v859_v34 = vrot.slane %v855_v35, 1  ;;  %s3277_s8 = sld [smem:[#allocation2 + $0x10]] }
 0x106   : > { %v870_v57 = vrot.slane %v866_v9, 2  ;;  %v1240_v4 = vadd.f32 %v1238_v43, %v2966_v59  ;;  %v871_v37 = vrot.slane %v867_v54, 2  ;;  %v1247_v30 = vrot.slane %v1243_v36, 1  ;;  %s3286_s9 = sld [smem:[#allocation2 + $0x19]] }
 0x107   : > { %v862_v21 = vadd.f32 %v858_v22, %v850_v42  ;;  %v1255_v47 = vmul.f32 %v1254_v16, %v2974_v46  ;;  %v1248_v58 = vrot.slane %v1244_v61, 1  ;;  %v1256_v44 = vmul.f32 %v1254_v16, %v2980_v6  ;;  %v305_v42 = vpop.permute.xlu1 %304  ;;  %s3290_s10 = sld [smem:[#allocation2 + $0x7]] }
 0x108   : > { %v1626_v2 = vmul.f32 %v1625_v11, %v2974_v46  ;;  %v1632_v59 = vmul.f32 %v1631_v56, %v2974_v46  ;;  %v863_v55 = vadd.f32 %v859_v34, %v851_v63  ;;  %v1251_v48 = vadd.f32 %v1247_v30, %v1239_v62 }
 0x109   : > { %v1627_v12 = vmul.f32 %v1625_v11, %v2980_v6  ;;  %v1633_v13 = vmul.f32 %v1631_v56, %v2980_v6  ;;  %v878_v14 = vmul.f32 %v877_v10, %v2974_v46  ;;  %v879_v16 = vmul.f32 %v877_v10, %v2980_v6 }
 0x10a   : > { %v1252_v49 = vadd.f32 %v1248_v58, %v1240_v4  ;;  %v1628_v17 = vadd.f32 %v1626_v2, %v2986_v31  ;;  %v874_v40 = vadd.f32 %v870_v57, %v862_v21  ;;  %v1259_v25 = vrot.slane %v1255_v47, 2 }
 0x10b   : > { %v1267_v11 = vmul.f32 %v1266_v1, %v2974_v46  ;;  %v1629_v56 = vadd.f32 %v1627_v12, %v2988_v8  ;;  %v1260_v50 = vrot.slane %v1256_v44, 2  ;;  %v1268_v27 = vmul.f32 %v1266_v1, %v2980_v6 }
 0x10c   : > { %v1636_v10 = vrot.slane %v1632_v59, 1  ;;  %v1644_v31 = vmul.f32 %v1643_v45, %v2974_v46  ;;  %v875_v5 = vadd.f32 %v871_v37, %v863_v55  ;;  %v1263_v51 = vadd.f32 %v1259_v25, %v1251_v48 }
 0x10d   : > { %v1637_v28 = vrot.slane %v1633_v13, 1  ;;  %v1645_v7 = vmul.f32 %v1643_v45, %v2980_v6  ;;  %v3075_v8 = vadd.f32 %v493_v60, %v485_v52  ;;  %v882_v29 = vrot.slane %v878_v14, 3  ;;  %v303_v45 = vpop.permute.xlu0 %302 }
 0x10e   : > { %v1264_v1 = vadd.f32 %v1260_v50, %v1252_v49  ;;  %v1640_v32 = vadd.f32 %v1636_v10, %v1628_v17  ;;  %v883_v53 = vrot.slane %v879_v16, 3  ;;  %v1271_v15 = vrot.slane %v1267_v11, 3 }
 0x10f   : > { %v1641_v35 = vadd.f32 %v1637_v28, %v1629_v56  ;;  %v1656_v9 = vmul.f32 %v1655_v19, %v2974_v46  ;;  %v498_v54 = vadd.f32 %v494_v38, %v486_v3  ;;  %v1272_v41 = vrot.slane %v1268_v27, 3 }
 0x110   : > { %v1648_v36 = vrot.slane %v1644_v31, 2  ;;  %v1657_v60 = vmul.f32 %v1655_v19, %v2980_v6  ;;  %v886_v43 = vadd.f32 %v882_v29, %v874_v40  ;;  %v887_v61 = vadd.f32 %v883_v53, %v875_v5 }
 0x111   : > { %v3087_v52 = vadd.f32 %v1271_v15, %v1263_v51  ;;  %v1649_v46 = vrot.slane %v1645_v7, 2  ;;  %v1276_v63 = vadd.f32 %v1272_v41, %v1264_v1  ;;  %v307_v22 = vsel %vm306_vm10, %v303_v45, %v305_v42 }
 0x112   : > { %v1652_v38 = vadd.f32 %v1648_v36, %v1640_v32  ;;  %v308_v6 = vsel %vm306_vm10, %v305_v42, %v303_v45  ;;  %v1660_v62 = vrot.slane %v1656_v9, 3  ;;  %v506_v3 = vstv %s3020_s11  ;;  %s3307_s11 = sld [smem:[#allocation2 + $0x22]] }
 0x113   : > { %v1653_v19 = vadd.f32 %v1649_v46, %v1641_v35  ;;  %v518_v34 = vstv %s3026_s17  ;;  %v1661_v57 = vrot.slane %v1657_v60, 3  ;;  %v530_v4 = vstv %s3029_s20  ;;  %v317_v60 = vpop.permute.xlu2 %316  ;;  %s3319_s17 = sld [smem:[#allocation2 + $0x28]] }
 0x114   : > { %v889_v21 = vstv %s3032_s18  ;;  %v895_v37 = vstv %s3036_s21  ;;  %v907_v30 = vstv %s3041_s22  ;;  %v919_v47 = vstv %s3045_s24  ;;  %s3322_s20 = sld [smem:[#allocation2 + $0x31]] }
 0x115   : > { %v3104_v58 = vsel %vm2658_vm1, %v308_v6, 0.0  ;;  %v3108_v44 = vsel %vm2671_vm3, %v307_v22, 0.0  ;;  %v3110_v2 = vadd.f32 %v1660_v62, %v1652_v38  ;;  %v1278_v59 = vstv %s3054_s25  ;;  %v319_v36 = vpop.permute.xlu0 %318  ;;  %s3335_s18 = sld [smem:[#allocation2 + $0x8]] }
 0x116   : > { %v1284_v55 = vstv %s3060_s26  ;;  %v1296_v48 = vstv %s3068_s28  ;;  %v3115_v12 = vadd.f32 %v1661_v57, %v1653_v19  ;;  %v1308_v13 = vstv %s3073_s29  ;;  %s3345_s21 = sld [smem:[#allocation2 + $0x3a]] }
 0x117   : > { %v1667_v14 = vstv %s3077_s30  ;;  %v1673_v16 = vstv %s3082_s0  ;;  %v501_v49 = vmul.f32 %v500_v26, %v3104_v58  ;;  %v502_v17 = vmul.f32 %v500_v26, %v3108_v44  ;;  %s3355_s22 = sld [smem:[#allocation2 + $0x43]] }
 0x118   : > { %v507_v40 = vmul.f32 %v506_v3, %v3104_v58  ;;  %v508_v25 = vmul.f32 %v506_v3, %v3108_v44  ;;  %v1685_v11 = vstv %s3089_s1  ;;  %v519_v56 = vmul.f32 %v518_v34, %v3104_v58  ;;  %s3372_s25 = sld [smem:[#allocation2 + $0x11]] }
 0x119   : > { %v520_v50 = vmul.f32 %v518_v34, %v3108_v44  ;;  %v890_v27 = vmul.f32 %v889_v21, %v3104_v58  ;;  %v891_v10 = vmul.f32 %v889_v21, %v3108_v44  ;;  %v3136_v31 = vmul.f32 %v895_v37, %v3104_v58  ;;  %s3376_s26 = sld [smem:[#allocation2 + $0x1a]] }
 0x11a   : > { %v3139_v26 = vmul.f32 %v895_v37, %v3108_v44  ;;  %v3145_v5 = vmul.f32 %v907_v30, %v3104_v58  ;;  %v3148_v51 = vmul.f32 %v907_v30, %v3108_v44  ;;  %v1279_v28 = vmul.f32 %v1278_v59, %v3104_v58  ;;  %s3388_s28 = sld [smem:[#allocation2 + $0x32]] }
 0x11b   : > { %v1280_v7 = vmul.f32 %v1278_v59, %v3108_v44  ;;  %v503_v29 = vadd.f32 %v501_v49, %v3075_v8  ;;  %v504_v1 = vadd.f32 %v502_v17, %v498_v54  ;;  %v511_v32 = vrot.slane %v507_v40, 1  ;;  %v331_v17 = vpop.permute.xlu1 %330  ;;  %s3398_s30 = sld [smem:[#allocation2 + $0x29]] }
 0x11c   : > { %v512_v53 = vrot.slane %v508_v25, 1  ;;  %v523_v15 = vrot.slane %v519_v56, 2  ;;  %v524_v35 = vrot.slane %v520_v50, 2  ;;  %v532_v9 = vmul.f32 %v530_v4, %v3108_v44  ;;  %s3404_s24 = sld [smem:[#allocation2 + $0x3b]] }
 0x11d   : > { %v3160_v42 = vadd.f32 %v890_v27, %v886_v43  ;;  %v3164_v45 = vadd.f32 %v891_v10, %v887_v61  ;;  %v900_v41 = vrot.slane %v3136_v31, 1  ;;  %v901_v8 = vrot.slane %v3139_v26, 1  ;;  %s3410_s0 = sld [smem:[#allocation2 + $0x44]] }
 0x11e   : > { %v3171_v54 = vmul.f32 %v919_v47, %v3108_v44  ;;  %v912_v46 = vrot.slane %v3145_v5, 2  ;;  %v913_v43 = vrot.slane %v3148_v51, 2  ;;  %v3176_v38 = vadd.f32 %v1279_v28, %v3087_v52  ;;  %s3527_s1 = sld [smem:[#allocation2 + $0x67]] }
 0x11f   : > { %v3178_v61 = vadd.f32 %v1280_v7, %v1276_v63  ;;  %v3183_v22 = vmul.f32 %v1284_v55, %v3104_v58  ;;  %v3186_v6 = vmul.f32 %v1284_v55, %v3108_v44  ;;  %v515_v19 = vadd.f32 %v511_v32, %v503_v29  ;;  %s3562_s29 = sld [smem:[#allocation2 + $0x5f]] }
 0x120   : > { %v516_v62 = vadd.f32 %v512_v53, %v504_v1  ;;  %v3190_v52 = vmul.f32 %v1296_v48, %v3104_v58  ;;  %v3193_v63 = vmul.f32 %v1296_v48, %v3108_v44  ;;  %v321_v3 = vsel %vm320_vm11, %v317_v60, %v319_v36 }
 0x121   : > { %v531_v34 = vmul.f32 %v530_v4, %v3104_v58  ;;  %v322_v57 = vsel %vm320_vm11, %v319_v36, %v317_v60  ;;  %v527_v21 = vadd.f32 %v523_v15, %v515_v19  ;;  %v536_v30 = vrot.slane %v532_v9, 3  ;;  %v333_v36 = vpop.permute.xlu2 %332 }
 0x122   : > { %v528_v37 = vadd.f32 %v524_v35, %v516_v62  ;;  %v542_v55 = vstv %s3132_s2  ;;  %v552_v48 = vstv %s3142_s14  ;;  %v562_v49 = vstv %s3152_s15  ;;  %s3425_s2 = sld [smem:[#allocation2 + $0x2a]] }
 0x123   : > { %v535_v59 = vrot.slane %v531_v34, 3  ;;  %v543_v4 = vmul.f32 %v542_v55, %v2594_v0  ;;  %v553_v25 = vmul.f32 %v552_v48, %v2594_v0  ;;  %v563_v56 = vmul.f32 %v562_v49, %v2594_v0  ;;  %s3428_s14 = sld [smem:[#allocation2 + $0x33]] }
 0x124   : > { %v540_v40 = vadd.f32 %v536_v30, %v528_v37  ;;  %v3214_v50 = vsel %vm2864_vm7, %v321_v3, 0.0  ;;  %v572_v10 = vstv %s3155_s3  ;;  %v588_v28 = vstv %s3162_s19  ;;  %s3435_s15 = sld [smem:[#allocation2 + $0x3c]] }
 0x125   : > { %v539_v27 = vadd.f32 %v535_v59, %v527_v21  ;;  %v545_v7 = vperm.slane %v543_v4, 0  ;;  %v546_v29 = vperm.slane %v543_v4, 4  ;;  %v555_v1 = vperm.slane %v553_v25, 1  ;;  %s3440_s3 = sld [smem:[#allocation2 + $0x45]] }
 0x126   : > { %v556_v32 = vperm.slane %v553_v25, 5  ;;  %v3221_v53 = vmul.f32 %v1308_v13, %v3108_v44  ;;  %v3225_v15 = vsel %vm2957_vm9, %v322_v57, 0.0  ;;  %v573_v35 = vmul.f32 %v572_v10, %v2594_v0  ;;  %s3456_s19 = sld [smem:[#allocation2 + $0x23]] }
 0x127   : > { %v582_v9 = vstv %s3180_s13  ;;  %v549_v60 = vadd.f32 %v545_v7, %v539_v27  ;;  %v550_v19 = vadd.f32 %v546_v29, %v540_v40  ;;  %v565_v62 = vperm.slane %v563_v56, 2  ;;  %s3460_s13 = sld [smem:[#allocation2 + $0x2b]] }
 0x128   : > { %v566_v3 = vperm.slane %v563_v56, 6  ;;  %v575_v34 = vperm.slane %v573_v35, 3  ;;  %v576_v57 = vperm.slane %v573_v35, 7  ;;  %v589_v21 = vmul.f32 %v588_v28, %v3214_v50  ;;  %v349_v56 = vpop.permute.xlu0 %348 }
 0x129   : > { %v559_v37 = vadd.f32 %v555_v1, %v549_v60  ;;  %v560_v30 = vadd.f32 %v556_v32, %v550_v19  ;;  %v590_v59 = vmul.f32 %v588_v28, %v3225_v15  ;;  %v600_v55 = vstv %s3202_s5  ;;  %v351_v32 = vpop.permute.xlu1 %350  ;;  %s3462_s5 = sld [smem:[#allocation2 + $0x34]] }
 0x12a   : > { %v1289_v48 = vrot.slane %v3183_v22, 1  ;;  %v3241_v49 = vmul.f32 %v1667_v14, %v3104_v58  ;;  %v336_v40 = vsel %vm334_vm12, %v333_v36, %v331_v17  ;;  %v583_v4 = vmul.f32 %v582_v9, %v3214_v50 }
 0x12b   : > { %v569_v27 = vadd.f32 %v565_v62, %v559_v37  ;;  %v570_v10 = vadd.f32 %v566_v3, %v560_v30  ;;  %v584_v28 = vmul.f32 %v582_v9, %v3225_v15  ;;  %v612_v7 = vstv %s3210_s12  ;;  %s3469_s12 = sld [smem:[#allocation2 + $0x3d]] }
 0x12c   : > { %v335_v29 = vsel %vm334_vm12, %v331_v17, %v333_v36  ;;  %v593_v24 = vrot.slane %v589_v21, 1  ;;  %v601_v1 = vmul.f32 %v600_v55, %v3214_v50  ;;  %v594_v19 = vrot.slane %v590_v59, 1 }
 0x12d   : > { %v579_v35 = vadd.f32 %v575_v34, %v569_v27  ;;  %v580_v60 = vadd.f32 %v576_v57, %v570_v10  ;;  %v602_v62 = vmul.f32 %v600_v55, %v3225_v15  ;;  %v3265_v9 = vsel %vm3250_vm14, %v336_v40, 0.0 }
 0x12e   : > { %v613_v3 = vmul.f32 %v612_v7, %v3214_v50  ;;  %v614_v17 = vmul.f32 %v612_v7, %v3225_v15  ;;  %v630_v36 = vstv %s3229_s27  ;;  %v3274_v21 = vsel %vm2658_vm1, %v335_v29, 0.0  ;;  %vm370_vm1 = vmand %vm338_vm13, %vm2957_vm9  ;;  %s3474_s27 = sld [smem:[#allocation2 + $0x46]] }
 0x12f   : > { %v585_v34 = vadd.f32 %v583_v4, %v579_v35  ;;  %v586_v57 = vadd.f32 %v584_v28, %v580_v60  ;;  %v624_v37 = vstv %s3231_s6  ;;  %v1290_v30 = vrot.slane %v3186_v6, 1  ;;  %s3480_s6 = sld [smem:[#allocation6]] }
 0x130   : > { %v1669_v59 = vmul.f32 %v1667_v14, %v3108_v44  ;;  %v354_v55 = vsel %vm352_vm15, %v351_v32, %v349_v56  ;;  %v605_v40 = vrot.slane %v601_v1, 2  ;;  %v606_v27 = vrot.slane %v602_v62, 2 }
 0x131   : > { %v597_v25 = vadd.f32 %v593_v24, %v585_v34  ;;  %v598_v23 = vadd.f32 %v594_v19, %v586_v57  ;;  %v632_v4 = vmul.f32 %v630_v36, %v3265_v9  ;;  %v617_v10 = vrot.slane %v613_v3, 3  ;;  %v363_v34 = vpop.permute.xlu2 %362 }
 0x132   : > { %v618_v28 = vrot.slane %v614_v17, 3  ;;  %v625_v7 = vmul.f32 %v624_v37, %v3274_v21  ;;  %v626_v14 = vmul.f32 %v624_v37, %v3265_v9  ;;  %v631_v24 = vmul.f32 %v630_v36, %v3274_v21  ;;  %v365_v17 = vpop.permute.xlu0 %364 }
 0x133   : > { %v609_v29 = vadd.f32 %v605_v40, %v597_v25  ;;  %v610_v35 = vadd.f32 %v606_v27, %v598_v23  ;;  %v642_v1 = vstv %s3256_s23  ;;  %v1301_v60 = vrot.slane %v3190_v52, 2  ;;  %s3485_s23 = sld [smem:[#allocation2 + $0x2c]] }
 0x134   : > { %v1302_v19 = vrot.slane %v3193_v63, 2  ;;  %v3299_v62 = vmul.f32 %v1673_v16, %v3104_v58  ;;  %v3304_v3 = vmul.f32 %v1673_v16, %v3108_v44  ;;  %vm366_vm0 = vcmp.lt.s32.totalorder %v2630_v18, 111 }
 0x135   : > { %v621_v36 = vadd.f32 %v617_v10, %v609_v29  ;;  %v622_v57 = vadd.f32 %v618_v28, %v610_v35  ;;  %v636_v37 = vrot.slane %v632_v4, 1  ;;  %v3311_v40 = vsel %vm352_vm15, %v349_v56, %v351_v32 }
 0x136   : > { %v3315_v25 = vsel %vm338_vm13, %v354_v55, 0.0  ;;  %v644_v16 = vmul.f32 %v642_v1, %v3265_v9  ;;  %v654_v23 = vstv %s3270_s4  ;;  %v635_v4 = vrot.slane %v631_v24, 1  ;;  %s3493_s4 = sld [smem:[#allocation2 + $0x35]] }
 0x137   : > { %v627_v27 = vadd.f32 %v625_v7, %v621_v36  ;;  %v628_v10 = vadd.f32 %v626_v14, %v622_v57  ;;  %v672_v28 = vstv %s3277_s8  ;;  %v3325_v56 = vadd.f32 %v1669_v59, %v3115_v12  ;;  %s3498_s8 = sld [smem:[#allocation2 + $0x4c]] }
 0x138   : > { %v3330_v32 = vmul.f32 %v1685_v11, %v3104_v58  ;;  %v367_v55 = vsel %vm366_vm0, %v363_v34, %v365_v17  ;;  %v643_v29 = vmul.f32 %v642_v1, %v3274_v21  ;;  %v368_v12 = vsel %vm366_vm0, %v365_v17, %v363_v34 }
 0x139   : > { %v640_v59 = vadd.f32 %v636_v37, %v628_v10  ;;  %v655_v7 = vmul.f32 %v654_v23, %v3274_v21  ;;  %v684_v14 = vstv %s3286_s9  ;;  %v656_v35 = vmul.f32 %v654_v23, %v3265_v9  ;;  %s3502_s9 = sld [smem:[#allocation2 + $0x55]] }
 0x13a   : > { %v666_v24 = vstv %s3290_s10  ;;  %v3350_v1 = vmul.f32 %v672_v28, %v3311_v40  ;;  %v3353_v33 = vmul.f32 %v672_v28, %v3315_v25  ;;  %v3360_v20 = vsel %vm2864_vm7, %v367_v55, 0.0  ;;  %s3511_s10 = sld [smem:[#allocation2 + $0x5e]] }
 0x13b   : > { %v639_v17 = vadd.f32 %v635_v4, %v627_v27  ;;  %v648_v34 = vrot.slane %v644_v16, 2  ;;  %v3362_v36 = vsel %vm370_vm1, %v368_v12, 0.0  ;;  %v647_v57 = vrot.slane %v643_v29, 2 }
 0x13c   : > { %v3365_v37 = vmul.f32 %v684_v14, %v3311_v40  ;;  %v3368_v23 = vmul.f32 %v684_v14, %v3315_v25  ;;  %v659_v28 = vrot.slane %v655_v7, 3  ;;  %v667_v39 = vmul.f32 %v666_v24, %v3311_v40 }
 0x13d   : > { %v652_v10 = vadd.f32 %v648_v34, %v640_v59  ;;  %v668_v55 = vmul.f32 %v666_v24, %v3315_v25  ;;  %v660_v16 = vrot.slane %v656_v35, 3  ;;  %v677_v27 = vrot.slane %v3350_v1, 1 }
 0x13e   : > { %v678_v4 = vrot.slane %v3353_v33, 1  ;;  %v904_v29 = vadd.f32 %v900_v41, %v3160_v42  ;;  %v651_v12 = vadd.f32 %v647_v57, %v639_v17  ;;  %v696_v59 = vstv %s3307_s11  ;;  %s3519_s11 = sld [smem:[#allocation2 + $0x3e]] }
 0x13f   : > { %v905_v7 = vadd.f32 %v901_v8, %v3164_v45  ;;  %v920_v14 = vmul.f32 %v919_v47, %v3104_v58  ;;  %v689_v35 = vrot.slane %v3365_v37, 2  ;;  %v690_v31 = vrot.slane %v3368_v23, 2 }
 0x140   : > { %v708_v24 = vstv %s3335_s18  ;;  %v916_v42 = vadd.f32 %v912_v46, %v904_v29  ;;  %v664_v41 = vadd.f32 %v660_v16, %v652_v10  ;;  %v925_v45 = vrot.slane %v3171_v54, 3  ;;  %s3557_s18 = sld [smem:[#allocation2 + $0x56]] }
 0x141   : > { %v917_v1 = vadd.f32 %v913_v43, %v905_v7  ;;  %v924_v26 = vrot.slane %v920_v14, 3  ;;  %v931_v47 = vstv %s3319_s17  ;;  %v941_v8 = vstv %s3322_s20  ;;  %s3538_s17 = sld [smem:[#allocation2 + $0x47]] }
 0x142   : > { %v951_v33 = vstv %s3345_s21  ;;  %v961_v17 = vstv %s3355_s22  ;;  %v663_v34 = vadd.f32 %v659_v28, %v651_v12  ;;  %v3407_v57 = vmul.f32 %v696_v59, %v3311_v40  ;;  %s3550_s20 = sld [smem:[#allocation2 + $0x4d]] }
 0x143   : > { %v698_v5 = vmul.f32 %v696_v59, %v3315_v25  ;;  %v928_v51 = vadd.f32 %v924_v26, %v916_v42  ;;  %v929_v54 = vadd.f32 %v925_v45, %v917_v1  ;;  %v932_v46 = vmul.f32 %v931_v47, %v2594_v0  ;;  %s3578_s21 = sld [smem:[#allocation2 + $0x68]] }
 0x144   : > { %v942_v43 = vmul.f32 %v941_v8, %v2594_v0  ;;  %v952_v23 = vmul.f32 %v951_v33, %v2594_v0  ;;  %v670_v10 = vadd.f32 %v668_v55, %v664_v41  ;;  %v3416_v28 = vmul.f32 %v708_v24, %v3360_v20  ;;  %s3580_s22 = sld [smem:[#allocation2 + $0x4e]] }
 0x145   : > { %v3419_v16 = vmul.f32 %v708_v24, %v3362_v36  ;;  %v962_v29 = vmul.f32 %v961_v17, %v2594_v0  ;;  %v934_v12 = vperm.slane %v932_v46, 0  ;;  %v935_v59 = vperm.slane %v932_v46, 4 }
 0x146   : > { %v944_v7 = vperm.slane %v942_v43, 1  ;;  %v945_v14 = vperm.slane %v942_v43, 5  ;;  %v669_v42 = vadd.f32 %v667_v39, %v663_v34  ;;  %v714_v1 = vstv %s3372_s25  ;;  %s3588_s25 = sld [smem:[#allocation2 + $0x57]] }
 0x147   : > { %v726_v26 = vstv %s3376_s26  ;;  %v977_v45 = vstv %s3388_s28  ;;  %v938_v47 = vadd.f32 %v934_v12, %v928_v51  ;;  %v939_v55 = vadd.f32 %v935_v59, %v929_v54  ;;  %s3594_s26 = sld [smem:[#allocation2 + $0x60]] }
 0x148   : > { %v954_v41 = vperm.slane %v952_v23, 2  ;;  %v955_v8 = vperm.slane %v952_v23, 6  ;;  %v682_v24 = vadd.f32 %v678_v4, %v670_v10  ;;  %v964_v33 = vperm.slane %v962_v29, 3  ;;  %s3600_s28 = sld [smem:[#allocation2 + $0x69]] }
 0x149   : > { %v965_v17 = vperm.slane %v962_v29, 7  ;;  %v971_v18 = vstv %s3398_s30  ;;  %v948_v46 = vadd.f32 %v944_v7, %v938_v47  ;;  %v949_v43 = vadd.f32 %v945_v14, %v939_v55  ;;  %s3608_s30 = sld [smem:[#allocation2 + $0x4f]] }
 0x14a   : > { %v978_v39 = vmul.f32 %v977_v45, %v3214_v50  ;;  %v979_v34 = vmul.f32 %v977_v45, %v3225_v15  ;;  %v681_v51 = vadd.f32 %v677_v27, %v669_v42  ;;  %v701_v54 = vrot.slane %v3407_v57, 3 }
 0x14b   : > { %v989_v12 = vstv %s3404_s24  ;;  %v1001_v59 = vstv %s3410_s0  ;;  %v958_v23 = vadd.f32 %v954_v41, %v948_v46  ;;  %v959_v4 = vadd.f32 %v955_v8, %v949_v43  ;;  %s3614_s24 = sld [smem:[#allocation2 + $0x58]] }
 0x14c   : > { %v972_v10 = vmul.f32 %v971_v18, %v3214_v50  ;;  %v973_v29 = vmul.f32 %v971_v18, %v3225_v15  ;;  %v694_v7 = vadd.f32 %v690_v31, %v682_v24  ;;  %v982_v14 = vrot.slane %v978_v39, 1  ;;  %s3620_s0 = sld [smem:[#allocation2 + $0x61]] }
 0x14d   : > { %v983_v47 = vrot.slane %v979_v34, 1  ;;  %v990_v55 = vmul.f32 %v989_v12, %v3214_v50  ;;  %v968_v27 = vadd.f32 %v964_v33, %v958_v23  ;;  %v969_v57 = vadd.f32 %v965_v17, %v959_v4 }
 0x14e   : > { %v991_v42 = vmul.f32 %v989_v12, %v3225_v15  ;;  %v1002_v45 = vmul.f32 %v1001_v59, %v3214_v50  ;;  %v702_v41 = vrot.slane %v698_v5, 3  ;;  %v3445_v8 = vmul.f32 %v714_v1, %v3360_v20 }
 0x14f   : > { %v716_v18 = vmul.f32 %v714_v1, %v3362_v36  ;;  %v1003_v31 = vmul.f32 %v1001_v59, %v3225_v15  ;;  %v693_v24 = vadd.f32 %v689_v35, %v681_v51  ;;  %v3454_v33 = vmul.f32 %v726_v26, %v3360_v20 }
 0x150   : > { %v974_v17 = vadd.f32 %v972_v10, %v968_v27  ;;  %v975_v46 = vadd.f32 %v973_v29, %v969_v57  ;;  %v706_v5 = vadd.f32 %v702_v41, %v694_v7  ;;  %v994_v43 = vrot.slane %v990_v55, 2 }
 0x151   : > { %v1013_v39 = vstv %s3425_s2  ;;  %v1019_v34 = vstv %s3428_s14  ;;  %v995_v37 = vrot.slane %v991_v42, 2  ;;  %v1006_v35 = vrot.slane %v1002_v45, 3  ;;  %s3624_s2 = sld [smem:[#allocation2 + $0x6a]] }
 0x152   : > { %v986_v1 = vadd.f32 %v982_v14, %v974_v17  ;;  %v987_v12 = vadd.f32 %v983_v47, %v975_v46  ;;  %v1007_v51 = vrot.slane %v1003_v31, 3  ;;  %v1020_v59 = vmul.f32 %v1019_v34, %v3274_v21  ;;  %s3631_s14 = sld [smem:[#allocation6 + $0x1]] }
 0x153   : > { %v1021_v23 = vmul.f32 %v1019_v34, %v3265_v9  ;;  %v1031_v4 = vstv %s3435_s15  ;;  %v1014_v7 = vmul.f32 %v1013_v39, %v3274_v21  ;;  %v1015_v55 = vmul.f32 %v1013_v39, %v3265_v9  ;;  %s3640_s15 = sld [smem:[#allocation2 + $0x50]] }
 0x154   : > { %v998_v10 = vadd.f32 %v994_v43, %v986_v1  ;;  %v999_v29 = vadd.f32 %v995_v37, %v987_v12  ;;  %v705_v14 = vadd.f32 %v701_v54, %v693_v24  ;;  %v1032_v47 = vmul.f32 %v1031_v4, %v3274_v21 }
 0x155   : > { %v1033_v27 = vmul.f32 %v1031_v4, %v3265_v9  ;;  %v1043_v57 = vstv %s3440_s3  ;;  %v1024_v41 = vrot.slane %v1020_v59, 1  ;;  %v1025_v31 = vrot.slane %v1021_v23, 1  ;;  %s3644_s3 = sld [smem:[#allocation2 + $0x59]] }
 0x156   : > { %v1010_v42 = vadd.f32 %v1006_v35, %v998_v10  ;;  %v1011_v45 = vadd.f32 %v1007_v51, %v999_v29  ;;  %v712_v17 = vadd.f32 %v3419_v16, %v706_v5  ;;  %v720_v46 = vrot.slane %v716_v18, 1 }
 0x157   : > { %v728_v43 = vmul.f32 %v726_v26, %v3362_v36  ;;  %v1044_v54 = vmul.f32 %v1043_v57, %v3274_v21  ;;  %v738_v24 = vstv %s3456_s19  ;;  %v1045_v1 = vmul.f32 %v1043_v57, %v3265_v9  ;;  %s3654_s19 = sld [smem:[#allocation2 + $0x62]] }
 0x158   : > { %v1016_v39 = vadd.f32 %v1014_v7, %v1010_v42  ;;  %v1017_v34 = vadd.f32 %v1015_v55, %v1011_v45  ;;  %v711_v16 = vadd.f32 %v3416_v28, %v705_v14  ;;  %v719_v18 = vrot.slane %v3445_v8, 1 }
 0x159   : > { %v1036_v5 = vrot.slane %v1032_v47, 2  ;;  %v1037_v12 = vrot.slane %v1033_v27, 2  ;;  %v1055_v35 = vstv %s3460_s13  ;;  %v1061_v51 = vstv %s3462_s5  ;;  %s3658_s13 = sld [smem:[#allocation2 + $0x8a]] }
 0x15a   : > { %v1028_v37 = vadd.f32 %v1024_v41, %v1016_v39  ;;  %v1029_v26 = vadd.f32 %v1025_v31, %v1017_v34  ;;  %v724_v59 = vadd.f32 %v720_v46, %v712_v17  ;;  %v732_v23 = vrot.slane %v728_v43, 2  ;;  %s3664_s5 = sld [smem:[#allocation2 + $0x70]] }
 0x15b   : > { %v740_v4 = vmul.f32 %v738_v24, %v3362_v36  ;;  %v1048_v10 = vrot.slane %v1044_v54, 3  ;;  %v1049_v55 = vrot.slane %v1045_v1, 3  ;;  %v1073_v57 = vstv %s3469_s12  ;;  %s3668_s12 = sld [smem:[#allocation2 + $0x79]] }
 0x15c   : > { %v1040_v29 = vadd.f32 %v1036_v5, %v1028_v37  ;;  %v1041_v7 = vadd.f32 %v1037_v12, %v1029_v26  ;;  %v723_v28 = vadd.f32 %v719_v18, %v711_v16  ;;  %v1056_v8 = vmul.f32 %v1055_v35, %v3311_v40 }
 0x15d   : > { %v1062_v14 = vmul.f32 %v1061_v51, %v3311_v40  ;;  %v1085_v47 = vstv %s3474_s27  ;;  %v1057_v45 = vmul.f32 %v1055_v35, %v3315_v25  ;;  %v1063_v41 = vmul.f32 %v1061_v51, %v3315_v25  ;;  %s3678_s27 = sld [smem:[#allocation2 + $0x82]] }
 0x15e   : > { %v1052_v27 = vadd.f32 %v1048_v10, %v1040_v29  ;;  %v1053_v42 = vadd.f32 %v1049_v55, %v1041_v7  ;;  %v3507_v31 = vmul.f32 %v1685_v11, %v3108_v44  ;;  %v736_v17 = vadd.f32 %v732_v23, %v724_v59 }
 0x15f   : > { %v1074_v46 = vmul.f32 %v1073_v57, %v3311_v40  ;;  %v1075_v43 = vmul.f32 %v1073_v57, %v3315_v25  ;;  %v731_v54 = vrot.slane %v3454_v33, 2  ;;  %v750_v39 = vstv %s3480_s6  ;;  %s2238_s6 = sshll.u32 %s2501_s16, 3 }
 0x160   : > { %v3516_v34 = vmul.f32 %v1085_v47, %v3311_v40  ;;  %v1097_v1 = vstv %s3485_s23  ;;  %v744_v16 = vrot.slane %v740_v4, 3  ;;  %v1058_v18 = vadd.f32 %v1056_v8, %v1052_v27  ;;  %s3688_s23 = sld [smem:[#allocation2 + $0x6b]] }
 0x161   : > { %v1066_v11 = vrot.slane %v1062_v14, 1  ;;  %v1087_v5 = vmul.f32 %v1085_v47, %v3315_v25  ;;  %v3522_v12 = vadd.f32 %v731_v54, %v723_v28  ;;  %v3525_v37 = vmul.f32 %v738_v24, %v3360_v20 }
 0x162   : > { %v1059_v33 = vadd.f32 %v1057_v45, %v1053_v42  ;;  %v1067_v26 = vrot.slane %v1063_v41, 1  ;;  %v3529_v35 = vadd.f32 %v744_v16, %v736_v17  ;;  %v1078_v51 = vrot.slane %v1074_v46, 2 }
 0x163   : > { %v1079_v59 = vrot.slane %v1075_v43, 2  ;;  %v3532_v23 = vmul.f32 %v1097_v1, %v3360_v20  ;;  %v1090_v4 = vrot.slane %v3516_v34, 3  ;;  %v3536_v10 = vmul.f32 %v1097_v1, %v3362_v36 }
 0x164   : > { %v1293_v24 = vadd.f32 %v1289_v48, %v3176_v38  ;;  %v1294_v29 = vadd.f32 %v1290_v30, %v3178_v61  ;;  %v1070_v7 = vadd.f32 %v1066_v11, %v1058_v18  ;;  %v1091_v55 = vrot.slane %v1087_v5, 3 }
 0x165   : > { %v1103_v57 = vstv %s3493_s4  ;;  %v1309_v28 = vmul.f32 %v1308_v13, %v3104_v58  ;;  %v1071_v8 = vadd.f32 %v1067_v26, %v1059_v33  ;;  %v1314_v22 = vrot.slane %v3221_v53, 3  ;;  %s3694_s4 = sld [smem:[#allocation6 + $0x2]] }
 0x166   : > { %v1305_v14 = vadd.f32 %v1301_v60, %v1293_v24  ;;  %v1306_v38 = vadd.f32 %v1302_v19, %v1294_v29  ;;  %v1320_v6 = vstv %s3498_s8  ;;  %v1330_v48 = vstv %s3502_s9  ;;  %s3701_s8 = sld [smem:[#allocation2 + $0x8b]] }
 0x167   : > { %v1313_v61 = vrot.slane %v1309_v28, 3  ;;  %v1340_v30 = vstv %s3511_s10  ;;  %v3565_v13 = vmul.f32 %v1103_v57, %v3360_v20  ;;  %v1115_v47 = vstv %s3519_s11  ;;  %s3707_s9 = sld [smem:[#allocation2 + $0x71]] }
 0x168   : > { %v1318_v52 = vadd.f32 %v1314_v22, %v1306_v38  ;;  %v1321_v60 = vmul.f32 %v1320_v6, %v2594_v0  ;;  %v3570_v63 = vmul.f32 %v1103_v57, %v3362_v36  ;;  %v1331_v19 = vmul.f32 %v1330_v48, %v2594_v0  ;;  %s3714_s10 = sld [smem:[#allocation2 + $0x7a]] }
 0x169   : > { %v1317_v53 = vadd.f32 %v1313_v61, %v1305_v14  ;;  %v1341_v27 = vmul.f32 %v1340_v30, %v2594_v0  ;;  %v1082_v42 = vadd.f32 %v1078_v51, %v1070_v7  ;;  %v1350_v17 = vstv %s3527_s1  ;;  %s3721_s11 = sld [smem:[#allocation2 + $0x83]] }
 0x16a   : > { %v1323_v45 = vperm.slane %v1321_v60, 0  ;;  %v1324_v41 = vperm.slane %v1321_v60, 4  ;;  %v1083_v46 = vadd.f32 %v1079_v59, %v1071_v8  ;;  %v3576_v43 = vmul.f32 %v1115_v47, %v3360_v20  ;;  %s3733_s1 = sld [smem:[#allocation2 + $0x8c]] }
 0x16b   : > { %v1333_v54 = vperm.slane %v1331_v19, 1  ;;  %v1334_v34 = vperm.slane %v1331_v19, 5  ;;  %v1343_v18 = vperm.slane %v1341_v27, 2  ;;  %v1344_v11 = vperm.slane %v1341_v27, 6 }
 0x16c   : > { %v1327_v1 = vadd.f32 %v1323_v45, %v1317_v53  ;;  %v1328_v16 = vadd.f32 %v1324_v41, %v1318_v52  ;;  %v3583_v5 = vmul.f32 %v1115_v47, %v3362_v36  ;;  %v1127_v33 = vstv %s3538_s17  ;;  %s3739_s17 = sld [smem:[#allocation2 + $0x72]] }
 0x16d   : > { %v1351_v26 = vmul.f32 %v1350_v17, %v2594_v0  ;;  %v1360_v51 = vstv %s3550_s20  ;;  %v1094_v59 = vadd.f32 %v1090_v4, %v1082_v42  ;;  %v1366_v7 = vstv %s3557_s18  ;;  %s3742_s20 = sld [smem:[#allocation2 + $0x7b]] }
 0x16e   : > { %v1337_v24 = vadd.f32 %v1333_v54, %v1327_v1  ;;  %v1338_v29 = vadd.f32 %v1334_v34, %v1328_v16  ;;  %v1095_v57 = vadd.f32 %v1091_v55, %v1083_v46  ;;  %v1378_v14 = vstv %s3562_s29  ;;  %s3747_s18 = sld [smem:[#allocation2 + $0x84]] }
 0x16f   : > { %v1353_v28 = vperm.slane %v1351_v26, 3  ;;  %v1354_v8 = vperm.slane %v1351_v26, 7  ;;  %v1361_v61 = vmul.f32 %v1360_v51, %v3214_v50  ;;  %v1362_v6 = vmul.f32 %v1360_v51, %v3225_v15  ;;  %s3752_s29 = sld [smem:[#allocation2 + $0x8d]] }
 0x170   : > { %v1347_v38 = vadd.f32 %v1343_v18, %v1337_v24  ;;  %v1348_v22 = vadd.f32 %v1344_v11, %v1338_v29  ;;  %v1108_v48 = vrot.slane %v3565_v13, 1  ;;  %v1109_v4 = vrot.slane %v3570_v63, 1 }
 0x171   : > { %v1367_v30 = vmul.f32 %v1366_v7, %v3214_v50  ;;  %v1368_v55 = vmul.f32 %v1366_v7, %v3225_v15  ;;  %v1379_v60 = vmul.f32 %v1378_v14, %v3214_v50  ;;  %v1380_v53 = vmul.f32 %v1378_v14, %v3225_v15 }
 0x172   : > { %v1357_v47 = vadd.f32 %v1353_v28, %v1347_v38  ;;  %v1358_v52 = vadd.f32 %v1354_v8, %v1348_v22  ;;  %v1100_v19 = vadd.f32 %v3532_v23, %v1094_v59  ;;  %v1120_v13 = vrot.slane %v3576_v43, 2 }
 0x173   : > { %v1371_v27 = vrot.slane %v1367_v30, 1  ;;  %v1372_v63 = vrot.slane %v1368_v55, 1  ;;  %v1101_v42 = vadd.f32 %v3536_v10, %v1095_v57  ;;  %v1390_v17 = vstv %s3578_s21  ;;  %s3764_s21 = sld [smem:[#allocation2 + $0x7c]] }
 0x174   : > { %v1363_v45 = vadd.f32 %v1361_v61, %v1357_v47  ;;  %v1364_v41 = vadd.f32 %v1362_v6, %v1358_v52  ;;  %v1391_v46 = vmul.f32 %v1390_v17, %v3214_v50  ;;  %v1392_v54 = vmul.f32 %v1390_v17, %v3225_v15 }
 0x175   : > { %v1402_v34 = vstv %s3580_s22  ;;  %v1408_v1 = vstv %s3588_s25  ;;  %v1383_v43 = vrot.slane %v1379_v60, 2  ;;  %v1384_v18 = vrot.slane %v1380_v53, 2  ;;  %s3767_s22 = sld [smem:[#allocation2 + $0x73]] }
 0x176   : > { %v1375_v16 = vadd.f32 %v1371_v27, %v1363_v45  ;;  %v1376_v23 = vadd.f32 %v1372_v63, %v1364_v41  ;;  %v1395_v10 = vrot.slane %v1391_v46, 3  ;;  %v1396_v11 = vrot.slane %v1392_v54, 3  ;;  %s3771_s25 = sld [smem:[#allocation2 + $0x85]] }
 0x177   : > { %v1403_v26 = vmul.f32 %v1402_v34, %v3274_v21  ;;  %v1404_v51 = vmul.f32 %v1402_v34, %v3265_v9  ;;  %v1409_v29 = vmul.f32 %v1408_v1, %v3274_v21  ;;  %v1410_v7 = vmul.f32 %v1408_v1, %v3265_v9 }
 0x178   : > { %v1387_v59 = vadd.f32 %v1383_v43, %v1375_v16  ;;  %v1388_v24 = vadd.f32 %v1384_v18, %v1376_v23  ;;  %v1112_v57 = vadd.f32 %v1108_v48, %v1100_v19  ;;  %v1113_v28 = vadd.f32 %v1109_v4, %v1101_v42 }
 0x179   : > { %v1420_v8 = vstv %s3594_s26  ;;  %v1432_v14 = vstv %s3600_s28  ;;  %v1413_v61 = vrot.slane %v1409_v29, 1  ;;  %v1414_v6 = vrot.slane %v1410_v7, 1  ;;  %s3779_s26 = sld [smem:[#allocation2 + $0x8e]] }
 0x17a   : > { %v1399_v38 = vadd.f32 %v1395_v10, %v1387_v59  ;;  %v1400_v22 = vadd.f32 %v1396_v11, %v1388_v24  ;;  %v1421_v30 = vmul.f32 %v1420_v8, %v3274_v21  ;;  %v1422_v55 = vmul.f32 %v1420_v8, %v3265_v9  ;;  %s3789_s28 = sld [smem:[#allocation2 + $0x7d]] }
 0x17b   : > { %v1433_v47 = vmul.f32 %v1432_v14, %v3274_v21  ;;  %v1434_v48 = vmul.f32 %v1432_v14, %v3265_v9  ;;  %v1121_v4 = vrot.slane %v3583_v5, 2  ;;  %v1444_v53 = vstv %s3608_s30  ;;  %s3792_s30 = sld [smem:[#allocation2 + $0x74]] }
 0x17c   : > { %v1405_v52 = vadd.f32 %v1403_v26, %v1399_v38  ;;  %v1406_v60 = vadd.f32 %v1404_v51, %v1400_v22  ;;  %v1124_v19 = vadd.f32 %v1120_v13, %v1112_v57  ;;  %v1128_v27 = vmul.f32 %v1127_v33, %v3360_v20 }
 0x17d   : > { %v1129_v63 = vmul.f32 %v1127_v33, %v3362_v36  ;;  %v1425_v42 = vrot.slane %v1421_v30, 2  ;;  %v1426_v5 = vrot.slane %v1422_v55, 2  ;;  %v1450_v17 = vstv %s3614_s24  ;;  %s3795_s24 = sld [smem:[#allocation2 + $0x86]] }
 0x17e   : > { %v1417_v45 = vadd.f32 %v1413_v61, %v1405_v52  ;;  %v1418_v41 = vadd.f32 %v1414_v6, %v1406_v60  ;;  %v1125_v46 = vadd.f32 %v1121_v4, %v1113_v28  ;;  %v1437_v54 = vrot.slane %v1433_v47, 3 }
 0x17f   : > { %v1438_v34 = vrot.slane %v1434_v48, 3  ;;  %v1446_v13 = vmul.f32 %v1444_v53, %v3315_v25  ;;  %v1452_v33 = vmul.f32 %v1450_v17, %v3315_v25  ;;  %v1462_v23 = vstv %s3620_s0  ;;  %s3805_s0 = sld [smem:[#allocation2 + $0x8f]] }
 0x180   : > { %v1429_v1 = vadd.f32 %v1425_v42, %v1417_v45  ;;  %v1430_v16 = vadd.f32 %v1426_v5, %v1418_v41  ;;  %v3651_v43 = vadd.f32 %v750_v39, %v3529_v35  ;;  %v1132_v18 = vrot.slane %v1128_v27, 3 }
 0x181   : > { %v1133_v10 = vrot.slane %v1129_v63, 3  ;;  %v1445_v11 = vmul.f32 %v1444_v53, %v3311_v40  ;;  %v1451_v59 = vmul.f32 %v1450_v17, %v3311_v40  ;;  %v1474_v24 = vstv %s3624_s2  ;;  %s3824_s2 = sld [smem:[#allocation6 + $0x3]] }
 0x182   : > { %v1441_v26 = vadd.f32 %v1437_v54, %v1429_v1  ;;  %v1442_v51 = vadd.f32 %v1438_v34, %v1430_v16  ;;  %v743_v29 = vrot.slane %v3525_v37, 3  ;;  %v1136_v7 = vadd.f32 %v1132_v18, %v1124_v19 }
 0x183   : > { %v1137_v57 = vadd.f32 %v1133_v10, %v1125_v46  ;;  %v3662_v35 = vmul.f32 %v1462_v23, %v3311_v40  ;;  %v1139_v28 = vstv %s3631_s14  ;;  %v1456_v14 = vrot.slane %v1452_v33, 1 }
 0x184   : > { %v1448_v8 = vadd.f32 %v1446_v13, %v1442_v51  ;;  %v1464_v38 = vmul.f32 %v1462_v23, %v3315_v25  ;;  %v1679_v22 = vrot.slane %v3304_v3, 1  ;;  %v3672_v61 = vadd.f32 %v743_v29, %v3522_v12 }
 0x185   : > { %v3675_v37 = vmul.f32 %v1474_v24, %v3311_v40  ;;  %v1486_v6 = vstv %s3640_s15  ;;  %v754_v30 = vmax.f32 %v3651_v43, 0.0  ;;  %v1447_v55 = vadd.f32 %v1445_v11, %v1441_v26 }
 0x186   : > { %v1455_v47 = vrot.slane %v1451_v59, 1  ;;  %v1476_v48 = vmul.f32 %v1474_v24, %v3315_v25  ;;  %v3682_v4 = vadd.f32 %v1139_v28, %v1136_v7  ;;  %v3684_v52 = vadd.f32 %v1139_v28, %v1137_v57 }
 0x187   : > { %v1467_v3 = vrot.slane %v3662_v35, 2  ;;  %v1492_v12 = vstv %s3644_s3  ;;  %v1460_v60 = vadd.f32 %v1456_v14, %v1448_v8  ;;  %v1468_v53 = vrot.slane %v1464_v38, 2  ;;  %s3926_s3 = sld [smem:[#allocation25_spill]] }
 0x188   : > { %v3691_v19 = vmul.f32 %v1486_v6, %v3360_v20  ;;  %v1488_v27 = vmul.f32 %v1486_v6, %v3362_v36  ;;  %v1479_v63 = vrot.slane %v3675_v37, 3  ;;  %v1504_v42 = vstv %s3654_s19 }
 0x189   : > { %v1670_v45 = vadd.f32 %v3241_v49, %v3110_v2  ;;  %v1683_v41 = vadd.f32 %v1679_v22, %v3325_v56  ;;  %v1459_v5 = vadd.f32 %v1455_v47, %v1447_v55  ;;  %v1480_v17 = vrot.slane %v1476_v48, 3 }
 0x18a   : > { %v3704_v46 = vmul.f32 %v1492_v12, %v3360_v20  ;;  %v1691_v54 = vrot.slane %v3507_v31, 2  ;;  %v3925_v34 = vrot.slane %v3299_v62, 1  ;;  %v1690_v2 = vrot.slane %v3330_v32, 2 }
 0x18b   : > { %v1697_v49 = vstv %s3658_s13  ;;  %v1709_v56 = vstv %s3664_s5  ;;  %v1472_v1 = vadd.f32 %v1468_v53, %v1460_v60  ;;  %v1719_v10 = vstv %s3668_s12  ;;  %s3927_s13 = sshll.u32 %s2584_s7, 3 }
 0x18c   : > { %v1682_v13 = vadd.f32 %v3925_v34, %v1670_v45  ;;  %v1695_v16 = vadd.f32 %v1691_v54, %v1683_v41  ;;  %v1698_v33 = vmul.f32 %v1697_v49, %v3104_v58  ;;  %v1699_v23 = vmul.f32 %v1697_v49, %v3108_v44  ;;  %s215_s5 = scalar_lea.vmem [#allocation9], %s3927_s13 }
 0x18d   : > { %v1710_v31 = vmul.f32 %v1709_v56, %v2594_v0  ;;  %v1729_v11 = vstv %s3678_s27  ;;  %v1494_v62 = vmul.f32 %v1492_v12, %v3362_v36  ;;  %v3725_v32 = vmul.f32 %v1504_v42, %v3360_v20  ;;  %s1976_s19 = scalar_lea.hbm %s3926_s3, %s2238_s6  ;;  %s1978_s12 = sshll.u32 %s215_s5, 4  ;;  %s1979_s12 = int_to_ptr.vmem [resolvable:$true] %s1978_s12 }
 0x18e   : > { %v1694_v18 = vadd.f32 %v1690_v2, %v1682_v13  ;;  %v1702_v26 = vrot.slane %v1698_v33, 3  ;;  %v1703_v51 = vrot.slane %v1699_v23, 3  ;;  %v1720_v58 = vmul.f32 %v1719_v10, %v2594_v0  ;;  %s1980_s27 = sshll.u32 %s1976_s19, 4  ;;  %s1981_s27 = int_to_ptr.hbm [resolvable:$true] %s1980_s27 }
 0x18f   : > { %v1712_v59 = vperm.slane %v1710_v31, 0  ;;  %v1713_v24 = vperm.slane %v1710_v31, 4  ;;  %v1730_v44 = vmul.f32 %v1729_v11, %v2594_v0  ;;  %v3730_v29 = vmul.f32 %v1504_v42, %v3362_v36 }
 0x190   : > { %v1516_v7 = vstv %s3688_s23  ;;  %v1706_v57 = vadd.f32 %v1702_v26, %v1694_v18  ;;  %v1707_v35 = vadd.f32 %v1703_v51, %v1695_v16  ;;  %v1471_v28 = vadd.f32 %v1467_v3, %v1459_v5  ;;  %s1965_s23 = scalar_lea.sflag [#allocation4], %s2584_s7 }
 0x191   : > { %v1484_v8 = vadd.f32 %v1480_v17, %v1472_v1  ;;  %v1722_v14 = vperm.slane %v1720_v58, 1  ;;  %v1723_v38 = vperm.slane %v1720_v58, 5  ;;  %v1732_v6 = vperm.slane %v1730_v44, 2 }
 0x192   : > { %v1716_v22 = vadd.f32 %v1712_v59, %v1706_v57  ;;  %v1717_v37 = vadd.f32 %v1713_v24, %v1707_v35  ;;  %v1733_v55 = vperm.slane %v1730_v44, 6  ;;  %v1528_v47 = vstv %s3694_s4  ;;  %s2388_s4 = sshra.s32 %s1981_s27, 4  ;;  %s2389_s4 = int_to_ptr.hbm [resolvable:$true] %s2388_s4 }
 0x193   : > { %v1739_v48 = vstv %s3701_s8  ;;  %v1749_v12 = vstv %s3707_s9  ;;  %v1755_v60 = vstv %s3714_s10  ;;  %v1497_v53 = vrot.slane %v3704_v46, 1  ;;  %s2390_s8 = scalar_lea.hbm %s2389_s4, 8  ;;  %p2395_p9 = scmp.lt.s32.totalorder %s2389_s4, %s3926_s3 }
 0x194   : > { %v1498_v42 = vrot.slane %v1494_v62, 1  ;;  %v1726_v45 = vadd.f32 %v1722_v14, %v1716_v22  ;;  %v1727_v41 = vadd.f32 %v1723_v38, %v1717_v37  ;;  %v1483_v3 = vadd.f32 %v1479_v63, %v1471_v28  ;;  %p2391_p1 = scmp.ne.s32.totalorder %s2389_s4, %s2390_s8 }
 0x195   : > { %v1740_v5 = vmul.f32 %v1739_v48, %v2594_v0  ;;  %v1756_v17 = vmul.f32 %v1755_v60, %v3214_v50  ;;  %v1767_v54 = vstv %s3721_s11  ;;  %v1490_v34 = vadd.f32 %v1488_v27, %v1484_v8  ;;  %s2394_s11 = scalar_lea.hbm %s3926_s3, 16 }
 0x196   : > { %v1736_v13 = vadd.f32 %v1732_v6, %v1726_v45  ;;  %v1737_v2 = vadd.f32 %v1733_v55, %v1727_v41  ;;  %v1750_v49 = vmul.f32 %v1749_v12, %v3214_v50  ;;  %v1751_v1 = vmul.f32 %v1749_v12, %v3225_v15  ;;  %p2392_p4 = pnand %p2391_p1, %p2549_p5  ;;  %p2396_p10 = scmp.lt.s32.totalorder %s2394_s11, %s2390_s8 }
 0x197   : > { %v1742_v46 = vperm.slane %v1740_v5, 3  ;;  %v1743_v56 = vperm.slane %v1740_v5, 7  ;;  %v1757_v63 = vmul.f32 %v1755_v60, %v3225_v15  ;;  %v1760_v16 = vrot.slane %v1756_v17, 1 }
 0x198   : > { %v1768_v33 = vmul.f32 %v1767_v54, %v3214_v50  ;;  %v1769_v23 = vmul.f32 %v1767_v54, %v3225_v15  ;;  %v1779_v18 = vstv %s3733_s1  ;;  %v1509_v62 = vrot.slane %v3725_v32, 2  ;;  %p2393_p8 = pneg %p2392_p4  ;;  %p2397_p2 = por %p2396_p10, %p2395_p9 }
 0x199   : > { %v1746_v27 = vadd.f32 %v1742_v46, %v1736_v13  ;;  %v1747_v31 = vadd.f32 %v1743_v56, %v1737_v2  ;;  %v1761_v10 = vrot.slane %v1757_v63, 1  ;;  %v1780_v11 = vmul.f32 %v1779_v18, %v3214_v50 }
 0x19a   : > { %v1510_v26 = vrot.slane %v3730_v29, 2  ;;  %v1518_v51 = vmul.f32 %v1516_v7, %v3362_v36  ;;  %v1781_v59 = vmul.f32 %v1779_v18, %v3225_v15  ;;  %v1489_v24 = vadd.f32 %v3691_v19, %v1483_v3  ;;  %p2398_p11 = pnand %p2397_p2, %p2393_p8 }
 0x19b   : > { %v1502_v58 = vadd.f32 %v1498_v42, %v1490_v34  ;;  %v1752_v44 = vadd.f32 %v1750_v49, %v1746_v27  ;;  %v1753_v57 = vadd.f32 %v1751_v1, %v1747_v31  ;;  %v1772_v50 = vrot.slane %v1768_v33, 2 }
 0x19c   : > { %v1773_v32 = vrot.slane %v1769_v23, 2  ;;  %v1791_v35 = vstv %s3739_s17  ;;  %v1797_v29 = vstv %s3742_s20  ;;  %v1784_v15 = vrot.slane %v1780_v11, 3 }
 0x19d   : > { %v1764_v28 = vadd.f32 %v1760_v16, %v1752_v44  ;;  %v1765_v8 = vadd.f32 %v1761_v10, %v1753_v57  ;;  %v1809_v14 = vstv %s3747_s18  ;;  %v1785_v38 = vrot.slane %v1781_v59, 3 }
 0x19e   : > { %v1792_v19 = vmul.f32 %v1791_v35, %v3274_v21  ;;  %v1798_v22 = vmul.f32 %v1797_v29, %v3274_v21  ;;  %v1799_v37 = vmul.f32 %v1797_v29, %v3265_v9  ;;  %v1793_v48 = vmul.f32 %v1791_v35, %v3265_v9 }
 0x19f   : > { %v1776_v6 = vadd.f32 %v1772_v50, %v1764_v28  ;;  %v1777_v55 = vadd.f32 %v1773_v32, %v1765_v8  ;;  %v1821_v12 = vstv %s3752_s29  ;;  %v1501_v60 = vadd.f32 %v1497_v53, %v1489_v24 }
 0x1a0   : > { %v1517_v42 = vmul.f32 %v1516_v7, %v3360_v20  ;;  %v1810_v45 = vmul.f32 %v1809_v14, %v3274_v21  ;;  %v1811_v41 = vmul.f32 %v1809_v14, %v3265_v9  ;;  %v1802_v17 = vrot.slane %v1798_v22, 1 }
 0x1a1   : > { %v1788_v3 = vadd.f32 %v1784_v15, %v1776_v6  ;;  %v1789_v5 = vadd.f32 %v1785_v38, %v1777_v55  ;;  %v1803_v54 = vrot.slane %v1799_v37, 1  ;;  %v1514_v34 = vadd.f32 %v1510_v26, %v1502_v58 }
 0x1a2   : > { %v1822_v13 = vmul.f32 %v1821_v12, %v3274_v21  ;;  %v1823_v2 = vmul.f32 %v1821_v12, %v3265_v9  ;;  %v1839_v49 = vstv %s3764_s21  ;;  %v1522_v53 = vrot.slane %v1518_v51, 3 }
 0x1a3   : > { %v1794_v46 = vadd.f32 %v1792_v19, %v1788_v3  ;;  %v1795_v7 = vadd.f32 %v1793_v48, %v1789_v5  ;;  %v1833_v56 = vstv %s3767_s22  ;;  %v1513_v1 = vadd.f32 %v1509_v62, %v1501_v60 }
 0x1a4   : > { %v1814_v63 = vrot.slane %v1810_v45, 2  ;;  %v1815_v16 = vrot.slane %v1811_v41, 2  ;;  %v1851_v33 = vstv %s3771_s25  ;;  %v1840_v9 = vmul.f32 %v1839_v49, %v3311_v40 }
 0x1a5   : > { %v1806_v23 = vadd.f32 %v1802_v17, %v1794_v46  ;;  %v1807_v21 = vadd.f32 %v1803_v54, %v1795_v7  ;;  %v1841_v18 = vmul.f32 %v1839_v49, %v3315_v25  ;;  %v1526_v27 = vadd.f32 %v1522_v53, %v1514_v34 }
 0x1a6   : > { %v1826_v31 = vrot.slane %v1822_v13, 3  ;;  %v1827_v10 = vrot.slane %v1823_v2, 3  ;;  %v1834_v11 = vmul.f32 %v1833_v56, %v3311_v40  ;;  %v1835_v51 = vmul.f32 %v1833_v56, %v3315_v25 }
 0x1a7   : > { %v1818_v62 = vadd.f32 %v1814_v63, %v1806_v23  ;;  %v1819_v26 = vadd.f32 %v1815_v16, %v1807_v21  ;;  %v1863_v59 = vstv %s3779_s26  ;;  %v1143_v24 = vmax.f32 %v3684_v52, 0.0 }
 0x1a8   : > { %v1521_v58 = vrot.slane %v1517_v42, 3  ;;  %v1852_v44 = vmul.f32 %v1851_v33, %v3311_v40  ;;  %v1853_v57 = vmul.f32 %v1851_v33, %v3315_v25  ;;  %v1844_v35 = vrot.slane %v1840_v9, 1 }
 0x1a9   : > { %v1830_v50 = vadd.f32 %v1826_v31, %v1818_v62  ;;  %v1831_v32 = vadd.f32 %v1827_v10, %v1819_v26  ;;  %v1845_v29 = vrot.slane %v1841_v18, 1  ;;  %v1530_v28 = vadd.f32 %v1528_v47, %v1526_v27 }
 0x1aa   : > { %v1864_v8 = vmul.f32 %v1863_v59, %v3311_v40  ;;  %v1865_v15 = vmul.f32 %v1863_v59, %v3315_v25  ;;  %v1881_v52 = vstv %s3789_s28  ;;  %v1142_v14 = vmax.f32 %v3682_v4, 0.0 }
 0x1ab   : > { %v1525_v38 = vadd.f32 %v1521_v58, %v1513_v1  ;;  %v1836_v19 = vadd.f32 %v1834_v11, %v1830_v50  ;;  %v1837_v22 = vadd.f32 %v1835_v51, %v1831_v32  ;;  %v1856_v37 = vrot.slane %v1852_v44, 2 }
 0x1ac   : > { %v1857_v6 = vrot.slane %v1853_v57, 2  ;;  %v1875_v55 = vstv %s3792_s30  ;;  %v1893_v48 = vstv %s3795_s24  ;;  %v1882_v42 = vmul.f32 %v1881_v52, %v3360_v20 }
 0x1ad   : > { %v1848_v12 = vadd.f32 %v1844_v35, %v1836_v19  ;;  %v1849_v60 = vadd.f32 %v1845_v29, %v1837_v22  ;;  %v1883_v40 = vmul.f32 %v1881_v52, %v3362_v36  ;;  %v1146_v45 = vrot.slane %v1143_v24, 4 }
 0x1ae   : > { %v1532_v25 = vmax.f32 %v1530_v28, 0.0  ;;  %v1868_v41 = vrot.slane %v1864_v8, 3  ;;  %v1869_v4 = vrot.slane %v1865_v15, 3  ;;  %v1876_v17 = vmul.f32 %v1875_v55, %v3360_v20 }
 0x1af   : > { %v1860_v3 = vadd.f32 %v1856_v37, %v1848_v12  ;;  %v1861_v5 = vadd.f32 %v1857_v6, %v1849_v60  ;;  %v1877_v54 = vmul.f32 %v1875_v55, %v3362_v36  ;;  %v1529_v34 = vadd.f32 %v1528_v47, %v1525_v38 }
 0x1b0   : > { %v1894_v13 = vmul.f32 %v1893_v48, %v3360_v20  ;;  %v1895_v2 = vmul.f32 %v1893_v48, %v3362_v36  ;;  %v1905_v49 = vstv %s3805_s0  ;;  %v1886_v7 = vrot.slane %v1882_v42, 1 }
 0x1b1   : > { %v1872_v53 = vadd.f32 %v1868_v41, %v1860_v3  ;;  %v1873_v46 = vadd.f32 %v1869_v4, %v1861_v5  ;;  %v1887_v56 = vrot.slane %v1883_v40, 1  ;;  %v751_v1 = vadd.f32 %v750_v39, %v3672_v61 }
 0x1b2   : > { %v1147_v63 = vsel %vm758_vm2, %v1142_v14, %v1146_v45  ;;  %v1535_v16 = vrot.slane %v1532_v25, 4  ;;  %v1906_v47 = vmul.f32 %v1905_v49, %v3360_v20  ;;  %v1907_v21 = vmul.f32 %v1905_v49, %v3362_v36 }
 0x1b3   : > { %v1878_v33 = vadd.f32 %v1876_v17, %v1872_v53  ;;  %v1879_v23 = vadd.f32 %v1877_v54, %v1873_v46  ;;  %v757_v9 = vrot.slane %v754_v30, 4  ;;  %v1531_v18 = vmax.f32 %v1529_v34, 0.0 }
 0x1b4   : > { %v1898_v10 = vrot.slane %v1894_v13, 2  ;;  %v1899_v11 = vrot.slane %v1895_v2, 2  ;;  %v753_v62 = vmax.f32 %v751_v1, 0.0  ;;  %v1148_v39 = vrot.slane %v1147_v63, 7 }
 0x1b5   : > { %v1890_v27 = vadd.f32 %v1886_v7, %v1878_v33  ;;  %v1891_v31 = vadd.f32 %v1887_v56, %v1879_v23  ;;  %v1536_v61 = vsel %vm758_vm2, %v1531_v18, %v1535_v16  ;;  %v1910_v59 = vrot.slane %v1906_v47, 3 }
 0x1b6   : > { %v1911_v24 = vrot.slane %v1907_v21, 3  ;;  %v1917_v58 = vstv %s3824_s2  ;;  %v759_v20 = vsel %vm758_vm2, %v753_v62, %v757_v9  ;;  %v1537_v36 = vrot.slane %v1536_v61, 6 }
 0x1b7   : > { %v1902_v26 = vadd.f32 %v1898_v10, %v1890_v27  ;;  %v1903_v51 = vadd.f32 %v1899_v11, %v1891_v31  ;;  %v1150_v30 = vadd.f32 %v1148_v39, %v2594_v0  ;;  %v761_v32 = vadd.f32 %v759_v20, %v2594_v0 }
 0x1b8   : > { %v1539_v35 = vadd.f32 %v1537_v36, %v2594_v0  ;;  %vm1949_vm3 = vcmask 1040384   ;;  %vm1955_vm5 = vcmask 1042432  }
 0x1b9   : > { %v1914_v44 = vadd.f32 %v1910_v59, %v1902_v26  ;;  %v1915_v43 = vadd.f32 %v1911_v24, %v1903_v51  ;;  %v1936_v28 = vperm.slane %v1150_v30, 5  ;;  %v1931_v52 = vperm.slane %v761_v32, 4 }
 0x1ba   : > { %v1935_v14 = vperm.slane %v1150_v30, 1  ;;  %v1941_v19 = vperm.slane %v1539_v35, 6  ;;  %v1930_v37 = vperm.slane %v761_v32, 0  ;;  %v1940_v55 = vperm.slane %v1539_v35, 2 }
 0x1bb   : > { %v1918_v57 = vadd.f32 %v1917_v58, %v1914_v44  ;;  %v1919_v50 = vadd.f32 %v1917_v58, %v1915_v43  ;;  %v1951_v6 = vsel %vm1949_vm3, %v1931_v52, %v1936_v28 }
 0x1bc   : > { %v1950_v12 = vsel %vm1949_vm3, %v1930_v37, %v1935_v14  ;;  %v1954_v60 = vsel %vm1952_vm4, %v1951_v6, %v1941_v19 }
 0x1bd   : > { %v1921_v29 = vmax.f32 %v1919_v50, 0.0  ;;  %v1920_v8 = vmax.f32 %v1918_v57, 0.0  ;;  %v1953_v40 = vsel %vm1952_vm4, %v1950_v12, %v1940_v55 }
 0x1bf   : > { %v1924_v15 = vrot.slane %v1921_v29, 4 }
 0x1c1   : > { %v1925_v38 = vsel %vm758_vm2, %v1920_v8, %v1924_v15 }
 0x1c2   : > { %v1926_v22 = vrot.slane %v1925_v38, 5 }
 0x1c4   : > { %v1928_v48 = vadd.f32 %v1926_v22, %v2594_v0 }
 0x1c6   : > { %v1946_v42 = vperm.slane %v1928_v48, 7  ;;  %v1945_v45 = vperm.slane %v1928_v48, 3 }
 0x1c8   : > { %v1957_v25 = vsel %vm1955_vm5, %v1954_v60, %v1946_v42  ;;  %v1956_v4 = vsel %vm1955_vm5, %v1953_v40, %v1945_v45 }
 0x1c9   : > { %v1960_v41 = vrot.slane %v1957_v25, 4 }
 0x1cb   : > { %v1961_v0 = vsel %vm758_vm2, %v1956_v4, %v1960_v41 }
 0x1cc   : > { %1963 = vst [vmem:[%s215_s5] sm:$0xff] %v1961_v0 }
 0x1cd   : > { %2401 = shalt.err (!%p2398_p11)
}
 0x1ce   : > { %2249 = dma.vmem_to_hbm [thread:$0]  (%p2549_p5), %s1979_s12, 128, %s1981_s27, %s1965_s23  }
 0x1cf PF: > { %s3929_s7 = sld [smem:[#allocation14_spill]] }
 0x1d0   : > { %s3931_s18 = sld [smem:[#allocation17_spill]] }
 0x1d5   : > { %s1992_s29 = sand.u32 1, %s3929_s7  }
 0x1d6   : > { %p3932_p12 = scmp.ge.s32.totalorder %s3931_s18, 2  ;;  %s1993_s21 = scalar_lea.sflag [#allocation4], %s1992_s29 }
 0x1d8   : > { %p2263_p13 = pnand %p3932_p12, %p2515_p6 }
 0x1da   : > { %p2264_p0 = pneg %p2263_p13 }
 0x1dc   : > { %2431 = dma.done.wait (%p2264_p0), %s1993_s21, 128  }
 0x1dd   : > { %2433 = vsyncadd (%p2264_p0), %s1993_s21, 4294967168  ;;  %s3933_s15 = sld [smem:[#allocation19_spill]] }
 0x1de   : > { %s3934_s12 = sld [smem:[#allocation15_spill]] }
 0x1df   : > { %s3935_s13 = sld [smem:[#allocation16_spill]] }
 0x1e0   : > { %s3936_s14 = sld [smem:[#allocation20_spill]] }
 0x1e3   : > { %p18_p3 = scmp.ge.s32.totalorder %s3933_s15, 4  }
 0x1e5   :  { %20 = sbr.rel (!%p18_p3) target bundleno = 12 (0xc), region = 86 }
 0x1ea   :  { %1999 = vsyncpa [#allocation3], 1 }
 0x1eb   :  { %2001 = vsyncpa [#allocation3 + $0x1], 1 }
 0x1ec   :  { %2002 = vsyncpa [#allocation4], 1 }
 0x1ed   :  { %2004 = vsyncpa [#allocation4 + $0x1], 1 }
 0x1ee   :  { %2005 = vsyncpa [#allocation5], 1 }
 0x1ef   :  { %2007 = vsyncpa [#allocation5 + $0x1], 1 }
 0x1f0   :  { %2008 = vsyncpa [#allocation7], 1 }

</bundles_post_ra>
